<compile_context>
chip_gen: v5e
topology: v5e:2x2
jax: 0.10.0
libtpu: 0.0.40
codegen_flags: <defaults>
</compile_context>

<pallas_src>
import functools
import math

import jax
import jax.numpy as jnp
from jax.experimental import pallas as pl
from jax.experimental.pallas import tpu as pltpu

# ----------------------------- config ---------------------------------------
B = 2             # batch (number of sentences)
S = 8             # sequence length
BS = B * S        # folded batch*seq rows fed to every matmul
H = 128           # hidden size, lane-dense (real model: 768)
NH = 2            # attention heads (head_dim = 64, same as the real model)
HD = H // NH      # true head dim
HDP = 128         # head dim padded to a full 128-lane slab
F = 512           # FFN intermediate (4*H, multiple of 128; real model: 3072)
VOCAB = 50        # vocab size
LAYERS = 2        # transformer layers (real model: 12)
LN_EPS = 1e-5


# --------------------------- kernel helpers ----------------------------------
def _layernorm(x, g, b, eps=LN_EPS):
    mu = jnp.mean(x, axis=-1, keepdims=True)
    var = jnp.mean((x - mu) * (x - mu), axis=-1, keepdims=True)
    return (x - mu) * jax.lax.rsqrt(var + eps) * g + b


# ------------------------------ fused kernel ---------------------------------
def fused_encoder_kernel(x_ref, bias_ref, pool_ref,
                         embg_ref, embb_ref,
                         wqkv_ref, bqkv_ref, wo_ref, bo_ref,
                         ln1g_ref, ln1b_ref,
                         w1_ref, b1_ref, w2_ref, b2_ref,
                         ln2g_ref, ln2b_ref,
                         o_ref, h_ref,
                         *, num_heads, pad_head_dim):
    l = pl.program_id(0)

    # ---- layer 0: embedding LayerNorm into the resident activation scratch ----
    @pl.when(l == 0)
    def _():
        h_ref[...] = _layernorm(x_ref[...], embg_ref[...], embb_ref[...])

    x = h_ref[...]                       # (BS, H) f32, resident across layers
    bias = bias_ref[...]                 # (BS, BS) block-diag + key-padding bias
    xb = x.astype(jnp.bfloat16)

    # ---- self attention: one fused QKV matmul (B*S rows on the MXU) ----------
    qkv = jnp.dot(xb, wqkv_ref[0],
                  preferred_element_type=jnp.float32) + bqkv_ref[0]   # (BS, 3*NH*HDP)

    bs_rows, hid = x.shape
    attn = jnp.zeros((bs_rows, hid), jnp.float32)
    for h in range(num_heads):           # static 128-lane-aligned slices
        q = qkv[:, h * pad_head_dim:(h + 1) * pad_head_dim].astype(jnp.bfloat16)
        k = qkv[:, (num_heads + h) * pad_head_dim:
                   (num_heads + h + 1) * pad_head_dim].astype(jnp.bfloat16)
        v = qkv[:, (2 * num_heads + h) * pad_head_dim:
                   (2 * num_heads + h + 1) * pad_head_dim].astype(jnp.bfloat16)

        # scores = q @ k^T (softmax scale already folded into the Q weights)
        s = jax.lax.dot_general(q, k, (((1,), (1,)), ((), ())),
                                preferred_element_type=jnp.float32) + bias
        m = jnp.max(s, axis=-1, keepdims=True)
        p = jnp.exp(s - m)
        p = p * pl.reciprocal(jnp.sum(p, axis=-1, keepdims=True), approx=True)

        ctx = jnp.dot(p.astype(jnp.bfloat16), v,
                      preferred_element_type=jnp.float32)              # (BS, HDP)
        # per-head output-projection accumulation (no concat / lane interleave)
        attn = attn + jnp.dot(ctx.astype(jnp.bfloat16), wo_ref[0, h],
                              preferred_element_type=jnp.float32)
    attn = attn + bo_ref[0]

    h1 = _layernorm(x + attn, ln1g_ref[0], ln1b_ref[0])

    # ---- feed forward ---------------------------------------------------------
    inter = jnp.dot(h1.astype(jnp.bfloat16), w1_ref[0],
                    preferred_element_type=jnp.float32) + b1_ref[0]
    inter = jax.nn.gelu(inter, approximate=True)
    ffn = jnp.dot(inter.astype(jnp.bfloat16), w2_ref[0],
                  preferred_element_type=jnp.float32) + b2_ref[0]

    h_ref[...] = _layernorm(h1 + ffn, ln2g_ref[0], ln2b_ref[0])

    # ---- last layer: masked sum-pool (matmul) + L2 normalize ------------------
    @pl.when(l == pl.num_programs(0) - 1)
    def _():
        # sum-pool is equivalent to mean-pool up to the L2 normalization
        emb = jnp.dot(pool_ref[...], h_ref[...],
                      preferred_element_type=jnp.float32)              # (B, H)
        sq = jnp.sum(emb * emb, axis=-1, keepdims=True)
        o_ref[...] = emb * jax.lax.rsqrt(jnp.maximum(sq, 1e-24))


# --------------------------- pallas wrapper -----------------------------------
def fused_forward_pallas(x_flat, bias, pool, p):
    bs_rows, h = x_flat.shape
    b = pool.shape[0]
    num_layers = p["wqkv"].shape[0]
    qkv_w = p["wqkv"].shape[2]
    nh = p["wo"].shape[1]
    hdp = p["wo"].shape[2]
    f = p["w1"].shape[2]

    def inv(shape):                       # grid-invariant block (loaded once)
        n = len(shape)
        return pl.BlockSpec(shape, lambda l, _n=n: (0,) * _n)

    def per_layer(shape):                 # streamed per-layer block
        n = len(shape)
        return pl.BlockSpec((1,) + shape, lambda l, _n=n: (l,) + (0,) * _n)

    grid_spec = pltpu.PrefetchScalarGridSpec(
        num_scalar_prefetch=0,
        grid=(num_layers,),
        in_specs=[
            inv((bs_rows, h)),            # x (B*S, H)
            inv((bs_rows, bs_rows)),      # additive attention bias
            inv((b, bs_rows)),            # sum-pool matrix
            inv((1, h)), inv((1, h)),     # embedding LayerNorm
            per_layer((h, qkv_w)), per_layer((1, qkv_w)),   # wqkv / bqkv
            per_layer((nh, hdp, h)), per_layer((1, h)),     # wo / bo
            per_layer((1, h)), per_layer((1, h)),           # ln1
            per_layer((h, f)), per_layer((1, f)),           # w1 / b1
            per_layer((f, h)), per_layer((1, h)),           # w2 / b2
            per_layer((1, h)), per_layer((1, h)),           # ln2
        ],
        out_specs=pl.BlockSpec((b, h), lambda l: (0, 0)),   # resident output
        scratch_shapes=[pltpu.VMEM((bs_rows, h), jnp.float32)],
    )

    kern = functools.partial(fused_encoder_kernel,
                             num_heads=nh, pad_head_dim=hdp)

    out = pl.pallas_call(
        kern,
        out_shape=jax.ShapeDtypeStruct((b, h), jnp.float32),
        grid_spec=grid_spec,
        compiler_params=pltpu.CompilerParams(
            # layer axis carries the activation -> sequential ("arbitrary").
            # At real H=768/F=3072 also set vmem_limit_bytes (v5e default 16 MiB).
            dimension_semantics=("arbitrary",)),
    )(x_flat, bias, pool,
      p["emb_ln_g"], p["emb_ln_b"],
      p["wqkv"], p["bqkv"], p["wo"], p["bo"],
      p["ln1g"], p["ln1b"],
      p["w1"], p["b1"], p["w2"], p["b2"],
      p["ln2g"], p["ln2b"])
    return out


# --------------------------- parameters & forward -----------------------------
def init_params(key):
    def nrm(k, shape, scale=0.02):
        return scale * jax.random.normal(k, shape, dtype=jnp.float32)

    keys = jax.random.split(key, 8)

    # per-head weights (true head dim HD), softmax scale folded into Q
    wq = nrm(keys[2], (LAYERS, NH, H, HD)) * (1.0 / math.sqrt(HD))
    wk = nrm(keys[3], (LAYERS, NH, H, HD))
    wv = nrm(keys[4], (LAYERS, NH, H, HD))

    def pad_heads(w):                     # (L, NH, H, HD) -> (L, NH, H, HDP), zero pad
        return jnp.pad(w, ((0, 0), (0, 0), (0, 0), (0, HDP - HD)))

    # fused QKV with 128-lane-aligned per-head slabs: [q_h0|q_h1|k_h0|k_h1|v_h0|v_h1]
    wqkv = jnp.concatenate([pad_heads(wq), pad_heads(wk), pad_heads(wv)], axis=1)
    wqkv = jnp.transpose(wqkv, (0, 2, 1, 3)).reshape(LAYERS, H, 3 * NH * HDP)

    wo = nrm(keys[5], (LAYERS, NH, HD, H))
    wo = jnp.pad(wo, ((0, 0), (0, 0), (0, HDP - HD), (0, 0)))   # zero pad rows

    return {
        "word_emb": nrm(keys[0], (VOCAB, H)),
        "pos_emb": nrm(keys[1], (S, H)),
        "emb_ln_g": jnp.ones((1, H), jnp.float32),
        "emb_ln_b": jnp.zeros((1, H), jnp.float32),
        # matmul weights in bf16 (MXU), biases / LayerNorm params in f32 (VPU)
        "wqkv": wqkv.astype(jnp.bfloat16),
        "bqkv": jnp.zeros((LAYERS, 1, 3 * NH * HDP), jnp.float32),
        "wo": wo.astype(jnp.bfloat16),
        "bo": jnp.zeros((LAYERS, 1, H), jnp.float32),
        "ln1g": jnp.ones((LAYERS, 1, H), jnp.float32),
        "ln1b": jnp.zeros((LAYERS, 1, H), jnp.float32),
        "w1": nrm(keys[6], (LAYERS, H, F)).astype(jnp.bfloat16),
        "b1": jnp.zeros((LAYERS, 1, F), jnp.float32),
        "w2": nrm(keys[7], (LAYERS, F, H)).astype(jnp.bfloat16),
        "b2": jnp.zeros((LAYERS, 1, H), jnp.float32),
        "ln2g": jnp.ones((LAYERS, 1, H), jnp.float32),
        "ln2b": jnp.zeros((LAYERS, 1, H), jnp.float32),
    }


@jax.jit
def sentence_encoder_forward(params, input_ids, attention_mask):
    """captions = {'input_ids': (B,S) int32, 'attention_mask': (B,S) int32}
       returns L2-normalized sentence embeddings of shape (B, H)."""
    bsz, s = input_ids.shape
    # embedding lookup + absolute positions (gather glue, plain JAX)
    x = (params["word_emb"][input_ids] + params["pos_emb"][None, :, :]).astype(jnp.float32)
    x_flat = x.reshape(bsz * s, -1)                   # fold batch into M

    maskf = attention_mask.astype(jnp.float32).reshape(-1)          # (B*S,)
    sent = jnp.arange(bsz * s, dtype=jnp.int32) // s                # sentence id / row
    same = (sent[:, None] == sent[None, :]).astype(jnp.float32)     # block diagonal
    bias = (same * maskf[None, :] - 1.0) * 1e9                      # 0 keep / -1e9 drop

    onehot = (jnp.arange(bsz, dtype=jnp.int32)[:, None] == sent[None, :]).astype(jnp.float32)
    pool = onehot * maskf[None, :]                                  # (B, B*S) sum-pool

    return fused_forward_pallas(x_flat, bias, pool, params)


# ------------------------------- main ----------------------------------------
if __name__ == "__main__":
    key = jax.random.PRNGKey(0)
    kp, ki = jax.random.split(key)

    params = init_params(kp)
    input_ids = jax.random.randint(ki, (B, S), 1, VOCAB, dtype=jnp.int32)
    attention_mask = jnp.array(
        [[1, 1, 1, 1, 1, 1, 1, 1],
         [1, 1, 1, 1, 1, 0, 0, 0]], dtype=jnp.int32)

    emb = sentence_encoder_forward(params, input_ids, attention_mask)
    emb = jax.block_until_ready(emb)

    assert emb.shape == (B, H), emb.shape
    assert bool(jnp.all(jnp.isfinite(emb)))
    # per-sentence embeddings are unit-normalized, as in sentence-transformers
    norms = jnp.sqrt(jnp.sum(emb * emb, axis=-1))
    assert bool(jnp.all(jnp.abs(norms - 1.0) < 1e-4)), norms
    print("KERNEL_OK")
</pallas_src>

<mosaic_0001>
module attributes {stable_mosaic.version = 11 : i64} {
  func.func @fused_encoder_kernel(%arg0: i32, %arg1: memref<16x128xf32, #tpu.memory_space<vmem>>, %arg2: memref<16x16xf32, #tpu.memory_space<vmem>>, %arg3: memref<2x16xf32, #tpu.memory_space<vmem>>, %arg4: memref<1x128xf32, #tpu.memory_space<vmem>>, %arg5: memref<1x128xf32, #tpu.memory_space<vmem>>, %arg6: memref<1x128x768xbf16, #tpu.memory_space<vmem>>, %arg7: memref<1x1x768xf32, #tpu.memory_space<vmem>>, %arg8: memref<1x2x128x128xbf16, #tpu.memory_space<vmem>>, %arg9: memref<1x1x128xf32, #tpu.memory_space<vmem>>, %arg10: memref<1x1x128xf32, #tpu.memory_space<vmem>>, %arg11: memref<1x1x128xf32, #tpu.memory_space<vmem>>, %arg12: memref<1x128x512xbf16, #tpu.memory_space<vmem>>, %arg13: memref<1x1x512xf32, #tpu.memory_space<vmem>>, %arg14: memref<1x512x128xbf16, #tpu.memory_space<vmem>>, %arg15: memref<1x1x128xf32, #tpu.memory_space<vmem>>, %arg16: memref<1x1x128xf32, #tpu.memory_space<vmem>>, %arg17: memref<1x1x128xf32, #tpu.memory_space<vmem>>, %arg18: memref<2x128xf32, #tpu.memory_space<vmem>>, %arg19: memref<16x128xf32, #tpu.memory_space<vmem>>) attributes {dimension_semantics = [#tpu.dimension_semantics<arbitrary>], iteration_bounds = array<i64: 2>, scalar_prefetch = 0 : i64, scratch_operands = 1 : i64, tpu.core_type = #tpu.core_type<tc>, window_params = [{pipeline_mode = #tpu.pipeline_mode<synchronous>, transform_indices = @transform_0, window_bounds = array<i64: 16, 128>}, {pipeline_mode = #tpu.pipeline_mode<synchronous>, transform_indices = @transform_1, window_bounds = array<i64: 16, 16>}, {pipeline_mode = #tpu.pipeline_mode<synchronous>, transform_indices = @transform_2, window_bounds = array<i64: 2, 16>}, {pipeline_mode = #tpu.pipeline_mode<synchronous>, transform_indices = @transform_3, window_bounds = array<i64: 1, 128>}, {pipeline_mode = #tpu.pipeline_mode<synchronous>, transform_indices = @transform_4, window_bounds = array<i64: 1, 128>}, {transform_indices = @transform_5, window_bounds = array<i64: 1, 128, 768>}, {transform_indices = @transform_6, window_bounds = array<i64: 1, 1, 768>}, {transform_indices = @transform_7, window_bounds = array<i64: 1, 2, 128, 128>}, {transform_indices = @transform_8, window_bounds = array<i64: 1, 1, 128>}, {transform_indices = @transform_9, window_bounds = array<i64: 1, 1, 128>}, {transform_indices = @transform_10, window_bounds = array<i64: 1, 1, 128>}, {transform_indices = @transform_11, window_bounds = array<i64: 1, 128, 512>}, {transform_indices = @transform_12, window_bounds = array<i64: 1, 1, 512>}, {transform_indices = @transform_13, window_bounds = array<i64: 1, 512, 128>}, {transform_indices = @transform_14, window_bounds = array<i64: 1, 1, 128>}, {transform_indices = @transform_15, window_bounds = array<i64: 1, 1, 128>}, {transform_indices = @transform_16, window_bounds = array<i64: 1, 1, 128>}, {pipeline_mode = #tpu.pipeline_mode<synchronous>, transform_indices = @transform_17, window_bounds = array<i64: 2, 128>}]} {
    %c0_i32 = arith.constant 0 : i32
    %0 = arith.cmpi eq, %arg0, %c0_i32 : i32
    %1 = arith.extui %0 : i1 to i32
    %c0_i32_0 = arith.constant 0 : i32
    %2 = arith.cmpi ne, %1, %c0_i32_0 : i32
    scf.if %2 {
      %c0_74 = arith.constant 0 : index
      %c0_75 = arith.constant 0 : index
      %159 = vector.load %arg1[%c0_74, %c0_75] : memref<16x128xf32, #tpu.memory_space<vmem>>, vector<16x128xf32>
      %c0_76 = arith.constant 0 : index
      %c0_77 = arith.constant 0 : index
      %160 = vector.load %arg4[%c0_76, %c0_77] : memref<1x128xf32, #tpu.memory_space<vmem>>, vector<1x128xf32>
      %c0_78 = arith.constant 0 : index
      %c0_79 = arith.constant 0 : index
      %161 = vector.load %arg5[%c0_78, %c0_79] : memref<1x128xf32, #tpu.memory_space<vmem>>, vector<1x128xf32>
      %cst_80 = arith.constant dense<0.000000e+00> : vector<16xf32>
      %162 = vector.multi_reduction <add>, %159, %cst_80 [1] : vector<16x128xf32> to vector<16xf32>
      %163 = vector.shape_cast %162 : vector<16xf32> to vector<16x1xf32>
      %cst_81 = arith.constant 1.280000e+02 : f32
      %164 = vector.broadcast %cst_81 : f32 to vector<16x1xf32>
      %165 = arith.divf %163, %164 : vector<16x1xf32>
      %166 = vector.broadcast %165 : vector<16x1xf32> to vector<16x128xf32>
      %167 = arith.subf %159, %166 : vector<16x128xf32>
      %168 = vector.broadcast %165 : vector<16x1xf32> to vector<16x128xf32>
      %169 = arith.subf %159, %168 : vector<16x128xf32>
      %170 = arith.mulf %167, %169 : vector<16x128xf32>
      %cst_82 = arith.constant dense<0.000000e+00> : vector<16xf32>
      %171 = vector.multi_reduction <add>, %170, %cst_82 [1] : vector<16x128xf32> to vector<16xf32>
      %172 = vector.shape_cast %171 : vector<16xf32> to vector<16x1xf32>
      %cst_83 = arith.constant 1.280000e+02 : f32
      %173 = vector.broadcast %cst_83 : f32 to vector<16x1xf32>
      %174 = arith.divf %172, %173 : vector<16x1xf32>
      %175 = vector.broadcast %165 : vector<16x1xf32> to vector<16x128xf32>
      %176 = arith.subf %159, %175 : vector<16x128xf32>
      %cst_84 = arith.constant 9.99999974E-6 : f32
      %177 = vector.broadcast %cst_84 : f32 to vector<16x1xf32>
      %178 = arith.addf %174, %177 : vector<16x1xf32>
      %179 = math.rsqrt %178 : vector<16x1xf32>
      %180 = vector.broadcast %179 : vector<16x1xf32> to vector<16x128xf32>
      %181 = arith.mulf %176, %180 : vector<16x128xf32>
      %182 = vector.broadcast %160 : vector<1x128xf32> to vector<16x128xf32>
      %183 = arith.mulf %181, %182 : vector<16x128xf32>
      %184 = vector.broadcast %161 : vector<1x128xf32> to vector<16x128xf32>
      %185 = arith.addf %183, %184 : vector<16x128xf32>
      %c0_85 = arith.constant 0 : index
      %c0_86 = arith.constant 0 : index
      %186 = vector.load %arg19[%c0_85, %c0_86] : memref<16x128xf32, #tpu.memory_space<vmem>>, vector<16x128xf32>
      tpu.vector_store %arg19[%c0_85, %c0_86], %185 {strides = array<i32>} : memref<16x128xf32, #tpu.memory_space<vmem>>, vector<16x128xf32>,
    } else {
    }
    %c0 = arith.constant 0 : index
    %c0_1 = arith.constant 0 : index
    %3 = vector.load %arg19[%c0, %c0_1] : memref<16x128xf32, #tpu.memory_space<vmem>>, vector<16x128xf32>
    %c0_2 = arith.constant 0 : index
    %c0_3 = arith.constant 0 : index
    %4 = vector.load %arg2[%c0_2, %c0_3] : memref<16x16xf32, #tpu.memory_space<vmem>>, vector<16x16xf32>
    %5 = arith.truncf %3 : vector<16x128xf32> to vector<16x128xbf16>
    %c0_4 = arith.constant 0 : index
    %c0_5 = arith.constant 0 : index
    %c0_6 = arith.constant 0 : index
    %6 = vector.load %arg6[%c0_4, %c0_5, %c0_6] : memref<1x128x768xbf16, #tpu.memory_space<vmem>>, vector<1x128x768xbf16>
    %7 = vector.shape_cast %6 : vector<1x128x768xbf16> to vector<128x768xbf16>
    %cst = arith.constant dense<0.000000e+00> : vector<16x768xf32>
    %8 = tpu.matmul %5, %7, %cst {dimension_numbers = #tpu.dot_dimension_numbers<[1], [0], [0], [1], [0, 0, 1, 1], [], []>} : vector<16x128xbf16>, vector<128x768xbf16>, vector<16x768xf32> -> vector<16x768xf32>
    %c0_7 = arith.constant 0 : index
    %c0_8 = arith.constant 0 : index
    %c0_9 = arith.constant 0 : index
    %9 = vector.load %arg7[%c0_7, %c0_8, %c0_9] : memref<1x1x768xf32, #tpu.memory_space<vmem>>, vector<1x1x768xf32>
    %10 = vector.shape_cast %9 : vector<1x1x768xf32> to vector<1x768xf32>
    %11 = vector.broadcast %10 : vector<1x768xf32> to vector<16x768xf32>
    %12 = arith.addf %8, %11 : vector<16x768xf32>
    %cst_10 = arith.constant 0.000000e+00 : f32
    %13 = vector.broadcast %cst_10 : f32 to vector<16x128xf32>
    %14 = vector.extract_strided_slice %12 {offsets = [0, 0], sizes = [16, 128], strides = [1, 1]} : vector<16x768xf32> to vector<16x128xf32>
    %15 = arith.truncf %14 : vector<16x128xf32> to vector<16x128xbf16>
    %16 = vector.extract_strided_slice %12 {offsets = [0, 256], sizes = [16, 128], strides = [1, 1]} : vector<16x768xf32> to vector<16x128xf32>
    %17 = arith.truncf %16 : vector<16x128xf32> to vector<16x128xbf16>
    %18 = vector.extract_strided_slice %12 {offsets = [0, 512], sizes = [16, 128], strides = [1, 1]} : vector<16x768xf32> to vector<16x128xf32>
    %19 = arith.truncf %18 : vector<16x128xf32> to vector<16x128xbf16>
    %cst_11 = arith.constant dense<0.000000e+00> : vector<16x16xf32>
    %20 = tpu.matmul %15, %17, %cst_11 {dimension_numbers = #tpu.dot_dimension_numbers<[1], [1], [0], [0], [0, 0, 1, 0], [], []>} : vector<16x128xbf16>, vector<16x128xbf16>, vector<16x16xf32> -> vector<16x16xf32>
    %21 = arith.addf %20, %4 : vector<16x16xf32>
    %cst_12 = arith.constant dense<0xFF800000> : vector<16xf32>
    %22 = vector.multi_reduction <maximumf>, %21, %cst_12 [1] : vector<16x16xf32> to vector<16xf32>
    %23 = vector.shape_cast %22 : vector<16xf32> to vector<16x1xf32>
    %24 = vector.broadcast %23 : vector<16x1xf32> to vector<16x16xf32>
    %25 = arith.subf %21, %24 : vector<16x16xf32>
    %26 = math.exp %25 : vector<16x16xf32>
    %cst_13 = arith.constant dense<0.000000e+00> : vector<16xf32>
    %27 = vector.multi_reduction <add>, %26, %cst_13 [1] : vector<16x16xf32> to vector<16xf32>
    %28 = vector.shape_cast %27 : vector<16xf32> to vector<16x1xf32>
    %29 = tpu.reciprocal %28 {approx = true} : vector<16x1xf32> -> vector<16x1xf32>
    %30 = vector.broadcast %29 : vector<16x1xf32> to vector<16x16xf32>
    %31 = arith.mulf %26, %30 : vector<16x16xf32>
    %32 = arith.truncf %31 : vector<16x16xf32> to vector<16x16xbf16>
    %cst_14 = arith.constant dense<0.000000e+00> : vector<16x128xf32>
    %33 = tpu.matmul %32, %19, %cst_14 {dimension_numbers = #tpu.dot_dimension_numbers<[1], [0], [0], [1], [0, 0, 1, 1], [], []>} : vector<16x16xbf16>, vector<16x128xbf16>, vector<16x128xf32> -> vector<16x128xf32>
    %34 = arith.truncf %33 : vector<16x128xf32> to vector<16x128xbf16>
    %c0_15 = arith.constant 0 : index
    %c0_16 = arith.constant 0 : index
    %c0_17 = arith.constant 0 : index
    %c0_18 = arith.constant 0 : index
    %35 = vector.load %arg8[%c0_15, %c0_16, %c0_17, %c0_18] : memref<1x2x128x128xbf16, #tpu.memory_space<vmem>>, vector<1x1x128x128xbf16>
    %36 = vector.shape_cast %35 : vector<1x1x128x128xbf16> to vector<128x128xbf16>
    %cst_19 = arith.constant dense<0.000000e+00> : vector<16x128xf32>
    %37 = tpu.matmul %34, %36, %cst_19 {dimension_numbers = #tpu.dot_dimension_numbers<[1], [0], [0], [1], [0, 0, 1, 1], [], []>} : vector<16x128xbf16>, vector<128x128xbf16>, vector<16x128xf32> -> vector<16x128xf32>
    %38 = arith.addf %13, %37 : vector<16x128xf32>
    %39 = vector.extract_strided_slice %12 {offsets = [0, 128], sizes = [16, 128], strides = [1, 1]} : vector<16x768xf32> to vector<16x128xf32>
    %40 = arith.truncf %39 : vector<16x128xf32> to vector<16x128xbf16>
    %41 = vector.extract_strided_slice %12 {offsets = [0, 384], sizes = [16, 128], strides = [1, 1]} : vector<16x768xf32> to vector<16x128xf32>
    %42 = arith.truncf %41 : vector<16x128xf32> to vector<16x128xbf16>
    %43 = vector.extract_strided_slice %12 {offsets = [0, 640], sizes = [16, 128], strides = [1, 1]} : vector<16x768xf32> to vector<16x128xf32>
    %44 = arith.truncf %43 : vector<16x128xf32> to vector<16x128xbf16>
    %cst_20 = arith.constant dense<0.000000e+00> : vector<16x16xf32>
    %45 = tpu.matmul %40, %42, %cst_20 {dimension_numbers = #tpu.dot_dimension_numbers<[1], [1], [0], [0], [0, 0, 1, 0], [], []>} : vector<16x128xbf16>, vector<16x128xbf16>, vector<16x16xf32> -> vector<16x16xf32>
    %46 = arith.addf %45, %4 : vector<16x16xf32>
    %cst_21 = arith.constant dense<0xFF800000> : vector<16xf32>
    %47 = vector.multi_reduction <maximumf>, %46, %cst_21 [1] : vector<16x16xf32> to vector<16xf32>
    %48 = vector.shape_cast %47 : vector<16xf32> to vector<16x1xf32>
    %49 = vector.broadcast %48 : vector<16x1xf32> to vector<16x16xf32>
    %50 = arith.subf %46, %49 : vector<16x16xf32>
    %51 = math.exp %50 : vector<16x16xf32>
    %cst_22 = arith.constant dense<0.000000e+00> : vector<16xf32>
    %52 = vector.multi_reduction <add>, %51, %cst_22 [1] : vector<16x16xf32> to vector<16xf32>
    %53 = vector.shape_cast %52 : vector<16xf32> to vector<16x1xf32>
    %54 = tpu.reciprocal %53 {approx = true} : vector<16x1xf32> -> vector<16x1xf32>
    %55 = vector.broadcast %54 : vector<16x1xf32> to vector<16x16xf32>
    %56 = arith.mulf %51, %55 : vector<16x16xf32>
    %57 = arith.truncf %56 : vector<16x16xf32> to vector<16x16xbf16>
    %cst_23 = arith.constant dense<0.000000e+00> : vector<16x128xf32>
    %58 = tpu.matmul %57, %44, %cst_23 {dimension_numbers = #tpu.dot_dimension_numbers<[1], [0], [0], [1], [0, 0, 1, 1], [], []>} : vector<16x16xbf16>, vector<16x128xbf16>, vector<16x128xf32> -> vector<16x128xf32>
    %59 = arith.truncf %58 : vector<16x128xf32> to vector<16x128xbf16>
    %c0_24 = arith.constant 0 : index
    %c1 = arith.constant 1 : index
    %c0_25 = arith.constant 0 : index
    %c0_26 = arith.constant 0 : index
    %60 = vector.load %arg8[%c0_24, %c1, %c0_25, %c0_26] : memref<1x2x128x128xbf16, #tpu.memory_space<vmem>>, vector<1x1x128x128xbf16>
    %61 = vector.shape_cast %60 : vector<1x1x128x128xbf16> to vector<128x128xbf16>
    %cst_27 = arith.constant dense<0.000000e+00> : vector<16x128xf32>
    %62 = tpu.matmul %59, %61, %cst_27 {dimension_numbers = #tpu.dot_dimension_numbers<[1], [0], [0], [1], [0, 0, 1, 1], [], []>} : vector<16x128xbf16>, vector<128x128xbf16>, vector<16x128xf32> -> vector<16x128xf32>
    %63 = arith.addf %38, %62 : vector<16x128xf32>
    %c0_28 = arith.constant 0 : index
    %c0_29 = arith.constant 0 : index
    %c0_30 = arith.constant 0 : index
    %64 = vector.load %arg9[%c0_28, %c0_29, %c0_30] : memref<1x1x128xf32, #tpu.memory_space<vmem>>, vector<1x1x128xf32>
    %65 = vector.shape_cast %64 : vector<1x1x128xf32> to vector<1x128xf32>
    %66 = vector.broadcast %65 : vector<1x128xf32> to vector<16x128xf32>
    %67 = arith.addf %63, %66 : vector<16x128xf32>
    %68 = arith.addf %3, %67 : vector<16x128xf32>
    %c0_31 = arith.constant 0 : index
    %c0_32 = arith.constant 0 : index
    %c0_33 = arith.constant 0 : index
    %69 = vector.load %arg10[%c0_31, %c0_32, %c0_33] : memref<1x1x128xf32, #tpu.memory_space<vmem>>, vector<1x1x128xf32>
    %70 = vector.shape_cast %69 : vector<1x1x128xf32> to vector<1x128xf32>
    %c0_34 = arith.constant 0 : index
    %c0_35 = arith.constant 0 : index
    %c0_36 = arith.constant 0 : index
    %71 = vector.load %arg11[%c0_34, %c0_35, %c0_36] : memref<1x1x128xf32, #tpu.memory_space<vmem>>, vector<1x1x128xf32>
    %72 = vector.shape_cast %71 : vector<1x1x128xf32> to vector<1x128xf32>
    %cst_37 = arith.constant dense<0.000000e+00> : vector<16xf32>
    %73 = vector.multi_reduction <add>, %68, %cst_37 [1] : vector<16x128xf32> to vector<16xf32>
    %74 = vector.shape_cast %73 : vector<16xf32> to vector<16x1xf32>
    %cst_38 = arith.constant 1.280000e+02 : f32
    %75 = vector.broadcast %cst_38 : f32 to vector<16x1xf32>
    %76 = arith.divf %74, %75 : vector<16x1xf32>
    %77 = vector.broadcast %76 : vector<16x1xf32> to vector<16x128xf32>
    %78 = arith.subf %68, %77 : vector<16x128xf32>
    %79 = vector.broadcast %76 : vector<16x1xf32> to vector<16x128xf32>
    %80 = arith.subf %68, %79 : vector<16x128xf32>
    %81 = arith.mulf %78, %80 : vector<16x128xf32>
    %cst_39 = arith.constant dense<0.000000e+00> : vector<16xf32>
    %82 = vector.multi_reduction <add>, %81, %cst_39 [1] : vector<16x128xf32> to vector<16xf32>
    %83 = vector.shape_cast %82 : vector<16xf32> to vector<16x1xf32>
    %cst_40 = arith.constant 1.280000e+02 : f32
    %84 = vector.broadcast %cst_40 : f32 to vector<16x1xf32>
    %85 = arith.divf %83, %84 : vector<16x1xf32>
    %86 = vector.broadcast %76 : vector<16x1xf32> to vector<16x128xf32>
    %87 = arith.subf %68, %86 : vector<16x128xf32>
    %cst_41 = arith.constant 9.99999974E-6 : f32
    %88 = vector.broadcast %cst_41 : f32 to vector<16x1xf32>
    %89 = arith.addf %85, %88 : vector<16x1xf32>
    %90 = math.rsqrt %89 : vector<16x1xf32>
    %91 = vector.broadcast %90 : vector<16x1xf32> to vector<16x128xf32>
    %92 = arith.mulf %87, %91 : vector<16x128xf32>
    %93 = vector.broadcast %70 : vector<1x128xf32> to vector<16x128xf32>
    %94 = arith.mulf %92, %93 : vector<16x128xf32>
    %95 = vector.broadcast %72 : vector<1x128xf32> to vector<16x128xf32>
    %96 = arith.addf %94, %95 : vector<16x128xf32>
    %97 = arith.truncf %96 : vector<16x128xf32> to vector<16x128xbf16>
    %c0_42 = arith.constant 0 : index
    %c0_43 = arith.constant 0 : index
    %c0_44 = arith.constant 0 : index
    %98 = vector.load %arg12[%c0_42, %c0_43, %c0_44] : memref<1x128x512xbf16, #tpu.memory_space<vmem>>, vector<1x128x512xbf16>
    %99 = vector.shape_cast %98 : vector<1x128x512xbf16> to vector<128x512xbf16>
    %cst_45 = arith.constant dense<0.000000e+00> : vector<16x512xf32>
    %100 = tpu.matmul %97, %99, %cst_45 {dimension_numbers = #tpu.dot_dimension_numbers<[1], [0], [0], [1], [0, 0, 1, 1], [], []>} : vector<16x128xbf16>, vector<128x512xbf16>, vector<16x512xf32> -> vector<16x512xf32>
    %c0_46 = arith.constant 0 : index
    %c0_47 = arith.constant 0 : index
    %c0_48 = arith.constant 0 : index
    %101 = vector.load %arg13[%c0_46, %c0_47, %c0_48] : memref<1x1x512xf32, #tpu.memory_space<vmem>>, vector<1x1x512xf32>
    %102 = vector.shape_cast %101 : vector<1x1x512xf32> to vector<1x512xf32>
    %103 = vector.broadcast %102 : vector<1x512xf32> to vector<16x512xf32>
    %104 = arith.addf %100, %103 : vector<16x512xf32>
    %105 = arith.mulf %104, %104 : vector<16x512xf32>
    %106 = arith.mulf %104, %105 : vector<16x512xf32>
    %cst_49 = arith.constant 4.471500e-02 : f32
    %107 = vector.broadcast %cst_49 : f32 to vector<16x512xf32>
    %108 = arith.mulf %107, %106 : vector<16x512xf32>
    %109 = arith.addf %104, %108 : vector<16x512xf32>
    %cst_50 = arith.constant 0.797884583 : f32
    %110 = vector.broadcast %cst_50 : f32 to vector<16x512xf32>
    %111 = arith.mulf %110, %109 : vector<16x512xf32>
    %112 = math.tanh %111 : vector<16x512xf32>
    %cst_51 = arith.constant 1.000000e+00 : f32
    %113 = vector.broadcast %cst_51 : f32 to vector<16x512xf32>
    %114 = arith.addf %113, %112 : vector<16x512xf32>
    %cst_52 = arith.constant 5.000000e-01 : f32
    %115 = vector.broadcast %cst_52 : f32 to vector<16x512xf32>
    %116 = arith.mulf %115, %114 : vector<16x512xf32>
    %117 = arith.mulf %104, %116 : vector<16x512xf32>
    %118 = arith.truncf %117 : vector<16x512xf32> to vector<16x512xbf16>
    %c0_53 = arith.constant 0 : index
    %c0_54 = arith.constant 0 : index
    %c0_55 = arith.constant 0 : index
    %119 = vector.load %arg14[%c0_53, %c0_54, %c0_55] : memref<1x512x128xbf16, #tpu.memory_space<vmem>>, vector<1x512x128xbf16>
    %120 = vector.shape_cast %119 : vector<1x512x128xbf16> to vector<512x128xbf16>
    %cst_56 = arith.constant dense<0.000000e+00> : vector<16x128xf32>
    %121 = tpu.matmul %118, %120, %cst_56 {dimension_numbers = #tpu.dot_dimension_numbers<[1], [0], [0], [1], [0, 0, 1, 1], [], []>} : vector<16x512xbf16>, vector<512x128xbf16>, vector<16x128xf32> -> vector<16x128xf32>
    %c0_57 = arith.constant 0 : index
    %c0_58 = arith.constant 0 : index
    %c0_59 = arith.constant 0 : index
    %122 = vector.load %arg15[%c0_57, %c0_58, %c0_59] : memref<1x1x128xf32, #tpu.memory_space<vmem>>, vector<1x1x128xf32>
    %123 = vector.shape_cast %122 : vector<1x1x128xf32> to vector<1x128xf32>
    %124 = vector.broadcast %123 : vector<1x128xf32> to vector<16x128xf32>
    %125 = arith.addf %121, %124 : vector<16x128xf32>
    %126 = arith.addf %96, %125 : vector<16x128xf32>
    %c0_60 = arith.constant 0 : index
    %c0_61 = arith.constant 0 : index
    %c0_62 = arith.constant 0 : index
    %127 = vector.load %arg16[%c0_60, %c0_61, %c0_62] : memref<1x1x128xf32, #tpu.memory_space<vmem>>, vector<1x1x128xf32>
    %128 = vector.shape_cast %127 : vector<1x1x128xf32> to vector<1x128xf32>
    %c0_63 = arith.constant 0 : index
    %c0_64 = arith.constant 0 : index
    %c0_65 = arith.constant 0 : index
    %129 = vector.load %arg17[%c0_63, %c0_64, %c0_65] : memref<1x1x128xf32, #tpu.memory_space<vmem>>, vector<1x1x128xf32>
    %130 = vector.shape_cast %129 : vector<1x1x128xf32> to vector<1x128xf32>
    %cst_66 = arith.constant dense<0.000000e+00> : vector<16xf32>
    %131 = vector.multi_reduction <add>, %126, %cst_66 [1] : vector<16x128xf32> to vector<16xf32>
    %132 = vector.shape_cast %131 : vector<16xf32> to vector<16x1xf32>
    %cst_67 = arith.constant 1.280000e+02 : f32
    %133 = vector.broadcast %cst_67 : f32 to vector<16x1xf32>
    %134 = arith.divf %132, %133 : vector<16x1xf32>
    %135 = vector.broadcast %134 : vector<16x1xf32> to vector<16x128xf32>
    %136 = arith.subf %126, %135 : vector<16x128xf32>
    %137 = vector.broadcast %134 : vector<16x1xf32> to vector<16x128xf32>
    %138 = arith.subf %126, %137 : vector<16x128xf32>
    %139 = arith.mulf %136, %138 : vector<16x128xf32>
    %cst_68 = arith.constant dense<0.000000e+00> : vector<16xf32>
    %140 = vector.multi_reduction <add>, %139, %cst_68 [1] : vector<16x128xf32> to vector<16xf32>
    %141 = vector.shape_cast %140 : vector<16xf32> to vector<16x1xf32>
    %cst_69 = arith.constant 1.280000e+02 : f32
    %142 = vector.broadcast %cst_69 : f32 to vector<16x1xf32>
    %143 = arith.divf %141, %142 : vector<16x1xf32>
    %144 = vector.broadcast %134 : vector<16x1xf32> to vector<16x128xf32>
    %145 = arith.subf %126, %144 : vector<16x128xf32>
    %cst_70 = arith.constant 9.99999974E-6 : f32
    %146 = vector.broadcast %cst_70 : f32 to vector<16x1xf32>
    %147 = arith.addf %143, %146 : vector<16x1xf32>
    %148 = math.rsqrt %147 : vector<16x1xf32>
    %149 = vector.broadcast %148 : vector<16x1xf32> to vector<16x128xf32>
    %150 = arith.mulf %145, %149 : vector<16x128xf32>
    %151 = vector.broadcast %128 : vector<1x128xf32> to vector<16x128xf32>
    %152 = arith.mulf %150, %151 : vector<16x128xf32>
    %153 = vector.broadcast %130 : vector<1x128xf32> to vector<16x128xf32>
    %154 = arith.addf %152, %153 : vector<16x128xf32>
    %c0_71 = arith.constant 0 : index
    %c0_72 = arith.constant 0 : index
    %155 = vector.load %arg19[%c0_71, %c0_72] : memref<16x128xf32, #tpu.memory_space<vmem>>, vector<16x128xf32>
    tpu.vector_store %arg19[%c0_71, %c0_72], %154 {strides = array<i32>} : memref<16x128xf32, #tpu.memory_space<vmem>>, vector<16x128xf32>,
    %c1_i32 = arith.constant 1 : i32
    %156 = arith.cmpi eq, %arg0, %c1_i32 : i32
    %157 = arith.extui %156 : i1 to i32
    %c0_i32_73 = arith.constant 0 : i32
    %158 = arith.cmpi ne, %157, %c0_i32_73 : i32
    scf.if %158 {
      %c0_74 = arith.constant 0 : index
      %c0_75 = arith.constant 0 : index
      %159 = vector.load %arg3[%c0_74, %c0_75] : memref<2x16xf32, #tpu.memory_space<vmem>>, vector<2x16xf32>
      %c0_76 = arith.constant 0 : index
      %c0_77 = arith.constant 0 : index
      %160 = vector.load %arg19[%c0_76, %c0_77] : memref<16x128xf32, #tpu.memory_space<vmem>>, vector<16x128xf32>
      %cst_78 = arith.constant dense<0.000000e+00> : vector<2x128xf32>
      %161 = tpu.matmul %159, %160, %cst_78 {dimension_numbers = #tpu.dot_dimension_numbers<[1], [0], [0], [1], [0, 0, 1, 1], [], []>} : vector<2x16xf32>, vector<16x128xf32>, vector<2x128xf32> -> vector<2x128xf32>
      %162 = arith.mulf %161, %161 : vector<2x128xf32>
      %cst_79 = arith.constant dense<0.000000e+00> : vector<2xf32>
      %163 = vector.multi_reduction <add>, %162, %cst_79 [1] : vector<2x128xf32> to vector<2xf32>
      %164 = vector.shape_cast %163 : vector<2xf32> to vector<2x1xf32>
      %cst_80 = arith.constant 1.000000e-24 : f32
      %165 = vector.broadcast %cst_80 : f32 to vector<2x1xf32>
      %166 = arith.maximumf %164, %165 : vector<2x1xf32>
      %167 = math.rsqrt %166 : vector<2x1xf32>
      %168 = vector.broadcast %167 : vector<2x1xf32> to vector<2x128xf32>
      %169 = arith.mulf %161, %168 : vector<2x128xf32>
      %c0_81 = arith.constant 0 : index
      %c0_82 = arith.constant 0 : index
      %170 = vector.load %arg18[%c0_81, %c0_82] : memref<2x128xf32, #tpu.memory_space<vmem>>, vector<2x128xf32>
      tpu.vector_store %arg18[%c0_81, %c0_82], %169 {strides = array<i32>} : memref<2x128xf32, #tpu.memory_space<vmem>>, vector<2x128xf32>,
    } else {
    }
    return
  }
  func.func @transform_0(%arg0: i32) -> (i32, i32) {
    %c0_i32 = arith.constant 0 : i32
    %c0_i32_0 = arith.constant 0 : i32
    %c0_i32_1 = arith.constant 0 : i32
    return %c0_i32, %c0_i32_0 : i32, i32
  }
  func.func @transform_1(%arg0: i32) -> (i32, i32) {
    %c0_i32 = arith.constant 0 : i32
    %c0_i32_0 = arith.constant 0 : i32
    %c0_i32_1 = arith.constant 0 : i32
    return %c0_i32, %c0_i32_0 : i32, i32
  }
  func.func @transform_2(%arg0: i32) -> (i32, i32) {
    %c0_i32 = arith.constant 0 : i32
    %c0_i32_0 = arith.constant 0 : i32
    %c0_i32_1 = arith.constant 0 : i32
    return %c0_i32, %c0_i32_0 : i32, i32
  }
  func.func @transform_3(%arg0: i32) -> (i32, i32) {
    %c0_i32 = arith.constant 0 : i32
    %c0_i32_0 = arith.constant 0 : i32
    %c0_i32_1 = arith.constant 0 : i32
    return %c0_i32, %c0_i32_0 : i32, i32
  }
  func.func @transform_4(%arg0: i32) -> (i32, i32) {
    %c0_i32 = arith.constant 0 : i32
    %c0_i32_0 = arith.constant 0 : i32
    %c0_i32_1 = arith.constant 0 : i32
    return %c0_i32, %c0_i32_0 : i32, i32
  }
  func.func @transform_5(%arg0: i32) -> (i32, i32, i32) {
    %c0_i32 = arith.constant 0 : i32
    %c0_i32_0 = arith.constant 0 : i32
    %c0_i32_1 = arith.constant 0 : i32
    return %arg0, %c0_i32, %c0_i32_0 : i32, i32, i32
  }
  func.func @transform_6(%arg0: i32) -> (i32, i32, i32) {
    %c0_i32 = arith.constant 0 : i32
    %c0_i32_0 = arith.constant 0 : i32
    %c0_i32_1 = arith.constant 0 : i32
    return %arg0, %c0_i32, %c0_i32_0 : i32, i32, i32
  }
  func.func @transform_7(%arg0: i32) -> (i32, i32, i32, i32) {
    %c0_i32 = arith.constant 0 : i32
    %c0_i32_0 = arith.constant 0 : i32
    %c0_i32_1 = arith.constant 0 : i32
    %c0_i32_2 = arith.constant 0 : i32
    return %arg0, %c0_i32, %c0_i32_0, %c0_i32_1 : i32, i32, i32, i32
  }
  func.func @transform_8(%arg0: i32) -> (i32, i32, i32) {
    %c0_i32 = arith.constant 0 : i32
    %c0_i32_0 = arith.constant 0 : i32
    %c0_i32_1 = arith.constant 0 : i32
    return %arg0, %c0_i32, %c0_i32_0 : i32, i32, i32
  }
  func.func @transform_9(%arg0: i32) -> (i32, i32, i32) {
    %c0_i32 = arith.constant 0 : i32
    %c0_i32_0 = arith.constant 0 : i32
    %c0_i32_1 = arith.constant 0 : i32
    return %arg0, %c0_i32, %c0_i32_0 : i32, i32, i32
  }
  func.func @transform_10(%arg0: i32) -> (i32, i32, i32) {
    %c0_i32 = arith.constant 0 : i32
    %c0_i32_0 = arith.constant 0 : i32
    %c0_i32_1 = arith.constant 0 : i32
    return %arg0, %c0_i32, %c0_i32_0 : i32, i32, i32
  }
  func.func @transform_11(%arg0: i32) -> (i32, i32, i32) {
    %c0_i32 = arith.constant 0 : i32
    %c0_i32_0 = arith.constant 0 : i32
    %c0_i32_1 = arith.constant 0 : i32
    return %arg0, %c0_i32, %c0_i32_0 : i32, i32, i32
  }
  func.func @transform_12(%arg0: i32) -> (i32, i32, i32) {
    %c0_i32 = arith.constant 0 : i32
    %c0_i32_0 = arith.constant 0 : i32
    %c0_i32_1 = arith.constant 0 : i32
    return %arg0, %c0_i32, %c0_i32_0 : i32, i32, i32
  }
  func.func @transform_13(%arg0: i32) -> (i32, i32, i32) {
    %c0_i32 = arith.constant 0 : i32
    %c0_i32_0 = arith.constant 0 : i32
    %c0_i32_1 = arith.constant 0 : i32
    return %arg0, %c0_i32, %c0_i32_0 : i32, i32, i32
  }
  func.func @transform_14(%arg0: i32) -> (i32, i32, i32) {
    %c0_i32 = arith.constant 0 : i32
    %c0_i32_0 = arith.constant 0 : i32
    %c0_i32_1 = arith.constant 0 : i32
    return %arg0, %c0_i32, %c0_i32_0 : i32, i32, i32
  }
  func.func @transform_15(%arg0: i32) -> (i32, i32, i32) {
    %c0_i32 = arith.constant 0 : i32
    %c0_i32_0 = arith.constant 0 : i32
    %c0_i32_1 = arith.constant 0 : i32
    return %arg0, %c0_i32, %c0_i32_0 : i32, i32, i32
  }
  func.func @transform_16(%arg0: i32) -> (i32, i32, i32) {
    %c0_i32 = arith.constant 0 : i32
    %c0_i32_0 = arith.constant 0 : i32
    %c0_i32_1 = arith.constant 0 : i32
    return %arg0, %c0_i32, %c0_i32_0 : i32, i32, i32
  }
  func.func @transform_17(%arg0: i32) -> (i32, i32) {
    %c0_i32 = arith.constant 0 : i32
    %c0_i32_0 = arith.constant 0 : i32
    %c0_i32_1 = arith.constant 0 : i32
    return %c0_i32, %c0_i32_0 : i32, i32
  }
}

</mosaic_0001>

<bundles_post_ra>
// kernel: mul.12
= control target key start
LH: loop header
LB: loop body
LE: loop exit
PB: predicated region body
PF: predicated region fallthrough
CT: control target
= control target key end

     0   :  { %vm7_vm0 = vcmask 64512   ;;  %vm13_vm1 = vcmask 130112   ;;  %s39_s0 = inlined_call_operand.vmem [shape: f32[2,8], index: 0, kind: input, shape index: {}]   ;;  %s40_s1 = inlined_call_operand.vmem [shape: f32[16], index: 1, kind: output, shape index: {}]  }
   0x1   :  { %v4_v0 = vld [vmem:[%s39_s0] sm:$0x3]  ;;  %s22_s0 = smov 8  }
   0x2   :  { %5 = vst [vmem:[#allocation1] sm:$0x3] %v4_v0 }
   0x9   :  { %v10_v1 = vld [vmem:[#allocation1 + $0x1] sm:$0x1]   ;;  %v6_v2 = vld [vmem:[#allocation1] sm:$0x1]  }
   0xa   :  { %11 = vrot.lane.b32.xlu0 %v10_v1, %s22_s0  ;;  %8 = vst.msk [vmem:[#allocation0] sm:$0x1] %vm7_vm0, %v6_v2  }
  0x7c   :  { %v12_v3 = vpop.permute.xlu0 %11  }
  0x7d   :  { %14 = vst.msk [vmem:[#allocation0] sm:$0x1] %vm13_vm1, %v12_v3  }
  0x84   :  { %v17_v4 = vld [vmem:[#allocation0] sm:$0x1] }
  0x85   :  { %20 = vst [vmem:[%s40_s1] sm:$0x1] %v17_v4 }

// kernel: sentence_encoder_forward.1
= control target key start
LH: loop header
LB: loop body
LE: loop exit
PB: predicated region body
PF: predicated region fallthrough
CT: control target
= control target key end

     0   :  { %s4250_s0 = inlined_call_operand.vmem [shape: f32[16,128], index: 0, kind: input, shape index: {}]   ;;  %s4251_s1 = inlined_call_operand.vmem [shape: f32[16,16], index: 1, kind: input, shape index: {}]   ;;  %s4252_s2 = inlined_call_operand.vmem [shape: f32[2,16], index: 2, kind: input, shape index: {}]   ;;  %s4253_s3 = inlined_call_operand.vmem [shape: f32[1,128], index: 3, kind: input, shape index: {}]   ;;  %s4254_s4 = inlined_call_operand.vmem [shape: f32[1,128], index: 4, kind: input, shape index: {}]   ;;  %s4255_s5 = inlined_call_operand.hbm [shape: bf16[2,128,768], index: 5, kind: input, shape index: {}]   ;;  %s4256_s6 = inlined_call_operand.vmem [shape: f32[2,1,768], index: 6, kind: input, shape index: {}]   ;;  %s4257_s7 = inlined_call_operand.hbm [shape: bf16[2,2,128,128], index: 7, kind: input, shape index: {}]   ;;  %s4258_s8 = inlined_call_operand.vmem [shape: f32[2,1,128], index: 8, kind: input, shape index: {}]   ;;  %s4259_s9 = inlined_call_operand.vmem [shape: f32[2,1,128], index: 9, kind: input, shape index: {}]   ;;  %s4260_s10 = inlined_call_operand.vmem [shape: f32[2,1,128], index: 10, kind: input, shape index: {}]   ;;  %s4261_s11 = inlined_call_operand.hbm [shape: bf16[2,128,512], index: 11, kind: input, shape index: {}]   ;;  %s4262_s12 = inlined_call_operand.vmem [shape: f32[2,1,512], index: 12, kind: input, shape index: {}]   ;;  %s4263_s13 = inlined_call_operand.hbm [shape: bf16[2,512,128], index: 13, kind: input, shape index: {}]   ;;  %s4264_s14 = inlined_call_operand.vmem [shape: f32[2,1,128], index: 14, kind: input, shape index: {}]   ;;  %s4265_s15 = inlined_call_operand.vmem [shape: f32[2,1,128], index: 15, kind: input, shape index: {}]   ;;  %s4266_s16 = inlined_call_operand.vmem [shape: f32[2,1,128], index: 16, kind: input, shape index: {}]   ;;  %s4267_s17 = inlined_call_operand.hbm [shape: f32[2,128], index: 17, kind: output, shape index: {}]  }
   0x1   :  { %4275 = sst [smem:[#allocation19_spill]] %s4250_s0 }
   0x2   :  { %4276 = sst [smem:[#allocation20_spill]] %s4251_s1 }
   0x3   :  { %4277 = sst [smem:[#allocation21_spill]] %s4252_s2 }
   0x4   :  { %4278 = sst [smem:[#allocation22_spill]] %s4253_s3 }
   0x5   :  { %4279 = sst [smem:[#allocation23_spill]] %s4254_s4 }
   0x6   :  { %4280 = sst [smem:[#allocation24_spill]] %s4255_s5 }
   0x7   :  { %4281 = sst [smem:[#allocation25_spill]] %s4257_s7 }
   0x8   :  { %4282 = sst [smem:[#allocation26_spill]] %s4261_s11 }
   0x9   :  { %4283 = sst [smem:[#allocation27_spill]] %s4263_s13 }
   0xa   :  { %4284 = sst [smem:[#allocation28_spill]] %s4264_s14 }
   0xb   :  { %4285 = sst [smem:[#allocation29_spill]] %s4265_s15 }
   0xc   :  { %4286 = sst [smem:[#allocation30_spill]] %s4266_s16 }
   0xd   :  { %4287 = sst [smem:[#allocation31_spill]] %s4267_s17 }
   0xe   :  { %22 = vsyncpa [#allocation4], 0 }
   0xf   :  { %24 = vsyncpa [#allocation4 + $0x1], 0 }
  0x10   :  { %25 = vsyncpa [#allocation7], 0 }
  0x11   :  { %27 = vsyncpa [#allocation7 + $0x1], 0 }
  0x12   :  { %28 = vsyncpa [#allocation10], 0 }
  0x13   :  { %30 = vsyncpa [#allocation10 + $0x1], 0 }
  0x14   :  { %31 = vsyncpa [#allocation5], 0  ;;  %s3668_s24 = smov 0   ;;  %s3670_s25 = smov 0  }
  0x15   :  { %s3672_s26 = smov 0   ;;  %s3674_s27 = smov 0  }
  0x16 LB: > { %4288 = sst [smem:[#allocation16_spill]] %s3563_s26  ;;  %s3687_s28 = sadd.s32 4294967295, %s3567_s27   ;;  %s3567_s27 = sphi %s3674_s27, %s4315_s27   ;;  %s3563_s26 = sphi %s3672_s26, %s4317_s26   ;;  %s3559_s25 = sphi %s3670_s25, %s4319_s25   ;;  %s3555_s24 = sphi %s3668_s24, %s4318_s24  }
  0x17   : > { %s3690_s29 = sadd.s32 1, %s3567_s27   ;;  %s149_s30 = sadd.s32 1, %s3563_s26 }
  0x18   : > { %4289 = sst [smem:[#allocation17_spill]] %s3690_s29  ;;  %s146_s0 = ssub.s32 %s3567_s27, %s3690_s29 }
  0x19   : > { %p147_p0 = scmp.eq.s32.totalorder %s146_s0, 0  ;;  %p156_p1 = scmp.ne.s32.totalorder %s3563_s26, %s3559_s25 }
  0x1a   : > { %p157_p2 = scmp.eq.s32.totalorder %s3567_s27, 0  ;;  %p162_p3 = scmp.ne.s32.totalorder %s3559_s25, %s3555_s24 }
  0x1b   : > { %s3700_s18 = scalar_select %p147_p0, %s3563_s26, %s149_s30  }
  0x1c   : > { %p158_p4 = por %p157_p2, %p156_p1  ;;  %p163_p5 = scmp.eq.s32.totalorder %s3687_s28, 0 }
  0x1d   : > { %4290 = sst [smem:[#allocation18_spill]] %s3700_s18  ;;  %p3271_p6 = scmp.lt.s32.totalorder %s3567_s27, 2 }
  0x1e   : > { %p3704_p7 = por %p163_p5, %p162_p3  ;;  %s3709_s1 = sand.u32 1, %s3563_s26  }
  0x1f   : > { %p3711_p8 = pnand %p3271_p6, %p158_p4  ;;  %s537_s21 = sand.u32 1, %s3567_s27  }
  0x20   : > { %s2560_s22 = sshll.u32 %s3709_s1, 7  ;;  %s3111_s23 = sshll.u32 %s3567_s27, 7 }
  0x21   : > { %s541_s24 = scalar_lea.vmem [#allocation6], %s2560_s22  ;;  %s4293_s7 = sld [smem:[#allocation25_spill]] }
  0x22   : > { %s549_s0 = sshll.u32 %s541_s24, 4  ;;  %s3721_s26 = scalar_lea.sflag [#allocation7], %s537_s21  ;;  %s550_s0 = int_to_ptr.vmem [resolvable:$true] %s549_s0 }
  0x23   : > { %p3377_p10 = pneg %p3711_p8 }
  0x27   : > { %s546_s29 = scalar_lea.hbm %s4293_s7, %s3111_s23  ;;  %s3380_s18 = scalar_lea.hbm %s4293_s7, 256 }
  0x28   : > { %s547_s17 = sshll.u32 %s546_s29, 4  ;;  %s548_s17 = int_to_ptr.hbm [resolvable:$true] %s547_s17 }
  0x29   : > { %s3373_s2 = sshra.s32 %s548_s17, 4  ;;  %s3374_s2 = int_to_ptr.hbm [resolvable:$true] %s3373_s2 }
  0x2a   : > { %s3375_s4 = scalar_lea.hbm %s3374_s2, 128  ;;  %p3381_p13 = scmp.lt.s32.totalorder %s3374_s2, %s4293_s7 }
  0x2b   : > { %p3376_p9 = scmp.ne.s32.totalorder %s3374_s2, %s3375_s4  ;;  %p3382_p0 = scmp.lt.s32.totalorder %s3380_s18, %s3375_s4 }
  0x2d   : > { %p3378_p11 = pnand %p3377_p10, %p3376_p9  ;;  %p3383_p1 = por %p3382_p0, %p3381_p13 }
  0x2f   : > { %p3379_p12 = pneg %p3378_p11 }
  0x31   : > { %p3384_p2 = pnand %p3383_p1, %p3379_p12 }
  0x33   : > { %3387 = shalt.err (!%p3384_p2)
}
  0x34   : > { %s4273_s29 = smov 64   ;;  %s4274_s21 = smov 4  }
  0x35   : > { %3264 = dma.hbm_to_vmem [thread:$0]  (!%p3711_p8), %s548_s17, 2048, %s550_s0, %s3721_s26, %s4273_s29, %s4273_s29, %s4274_s21  }
  0x36   : > { %p2569_p3 = scmp.ge.s32.totalorder %s3567_s27, 1  ;;  %p644_p4 = scmp.lt.s32.totalorder %s3567_s27, 3 }
  0x37   : > { %s3242_s2 = smul.u32 384, %s3709_s1  ;;  %s4295_s5 = sld [smem:[#allocation24_spill]] }
  0x38   : > { %p3743_p5 = pnand %p2569_p3, %p644_p4  ;;  %s3243_s22 = smul.u32 384, %s3567_s27 }
  0x39   : > { %s512_s30 = scalar_lea.vmem [#allocation3], %s3242_s2  ;;  %s509_s16 = scalar_lea.sflag [#allocation4], %s3709_s1 }
  0x3a   : > { %s520_s7 = sshll.u32 %s512_s30, 4  ;;  %s521_s7 = int_to_ptr.vmem [resolvable:$true] %s520_s7 }
  0x3d   : > { %s517_s23 = scalar_lea.hbm %s4295_s5, %s3243_s22  ;;  %s3410_s15 = scalar_lea.hbm %s4295_s5, 768 }
  0x3e   : > { %s518_s3 = sshll.u32 %s517_s23, 4  ;;  %s519_s3 = int_to_ptr.hbm [resolvable:$true] %s518_s3 }
  0x3f   : > { %s3403_s17 = sshra.s32 %s519_s3, 4  ;;  %s3404_s17 = int_to_ptr.hbm [resolvable:$true] %s3403_s17 }
  0x40   : > { %s3405_s0 = scalar_lea.hbm %s3404_s17, 384  ;;  %p3411_p12 = scmp.lt.s32.totalorder %s3404_s17, %s4295_s5 }
  0x41   : > { %p3406_p6 = scmp.ne.s32.totalorder %s3404_s17, %s3405_s0  ;;  %p3412_p13 = scmp.lt.s32.totalorder %s3410_s15, %s3405_s0 }
  0x43   : > { %p3408_p9 = pnand %p3406_p6, %p3377_p10  ;;  %p3413_p0 = por %p3412_p13, %p3411_p12 }
  0x45   : > { %p3409_p11 = pneg %p3408_p9 }
  0x47   : > { %p3414_p1 = pnand %p3413_p0, %p3409_p11 }
  0x49   : > { %3417 = shalt.err (!%p3414_p1)
}
  0x4a   : > { %s3571_s2 = smov 384   ;;  %s3572_s18 = smov 24  }
  0x4b   : > { %3261 = dma.hbm_to_vmem [thread:$0]  (!%p3711_p8), %s519_s3, 6144, %s521_s7, %s509_s16, %s3571_s2, %s3571_s2, %s3572_s18  }
  0x4c   : > { %s2563_s23 = sshll.u32 %s3709_s1, 8  ;;  %s3112_s30 = sshll.u32 %s3567_s27, 8 }
  0x4d   : > { %s4296_s11 = sld [smem:[#allocation26_spill]]  ;;  %s581_s17 = scalar_lea.vmem [#allocation8], %s2563_s23 }
  0x4e   : > { %s589_s15 = sshll.u32 %s581_s17, 4  ;;  %s590_s15 = int_to_ptr.vmem [resolvable:$true] %s589_s15 }
  0x53   : > { %s586_s14 = scalar_lea.hbm %s4296_s11, %s3112_s30  ;;  %s3440_s16 = scalar_lea.hbm %s4296_s11, 512 }
  0x54   : > { %s587_s24 = sshll.u32 %s586_s14, 4  ;;  %s588_s24 = int_to_ptr.hbm [resolvable:$true] %s587_s24 }
  0x55   : > { %s3433_s0 = sshra.s32 %s588_s24, 4  ;;  %s3434_s0 = int_to_ptr.hbm [resolvable:$true] %s3433_s0 }
  0x56   : > { %s3435_s22 = scalar_lea.hbm %s3434_s0, 256  ;;  %p3441_p6 = scmp.lt.s32.totalorder %s3434_s0, %s4296_s11 }
  0x57   : > { %p3436_p2 = scmp.ne.s32.totalorder %s3434_s0, %s3435_s22  ;;  %p3442_p9 = scmp.lt.s32.totalorder %s3440_s16, %s3435_s22 }
  0x59   : > { %p3438_p3 = pnand %p3436_p2, %p3377_p10  ;;  %p3443_p11 = por %p3442_p9, %p3441_p6 }
  0x5b   : > { %p3439_p4 = pneg %p3438_p3 }
  0x5d   : > { %p3444_p12 = pnand %p3443_p11, %p3439_p4 }
  0x5f   : > { %3447 = shalt.err (!%p3444_p12)
}
  0x60   : > { %s3573_s14 = smov 256   ;;  %s3574_s18 = smov 16  }
  0x61   : > { %3267 = dma.hbm_to_vmem [thread:$0]  (!%p3711_p8), %s588_s24, 4096, %s590_s15, %s3721_s26, %s3573_s14, %s3573_s14, %s3574_s18  }
  0x62   : > { %s4297_s13 = sld [smem:[#allocation27_spill]]  ;;  %s610_s3 = scalar_lea.vmem [#allocation9], %s2563_s23 }
  0x63   : > { %s618_s7 = sshll.u32 %s610_s3, 4  ;;  %s607_s0 = scalar_lea.sflag [#allocation10], %s3709_s1  ;;  %s619_s7 = int_to_ptr.vmem [resolvable:$true] %s618_s7 }
  0x68   : > { %s615_s17 = scalar_lea.hbm %s4297_s13, %s3112_s30  ;;  %s3470_s24 = scalar_lea.hbm %s4297_s13, 512 }
  0x69   : > { %s616_s27 = sshll.u32 %s615_s17, 4  ;;  %s617_s27 = int_to_ptr.hbm [resolvable:$true] %s616_s27 }
  0x6a   : > { %s3463_s22 = sshra.s32 %s617_s27, 4  ;;  %s3464_s22 = int_to_ptr.hbm [resolvable:$true] %s3463_s22 }
  0x6b   : > { %s3465_s16 = scalar_lea.hbm %s3464_s22, 256  ;;  %p3471_p2 = scmp.lt.s32.totalorder %s3464_s22, %s4297_s13 }
  0x6c   : > { %p3466_p13 = scmp.ne.s32.totalorder %s3464_s22, %s3465_s16  ;;  %p3472_p3 = scmp.lt.s32.totalorder %s3470_s24, %s3465_s16 }
  0x6e   : > { %p3468_p0 = pnand %p3466_p13, %p3377_p10  ;;  %p3473_p4 = por %p3472_p3, %p3471_p2 }
  0x70   : > { %p3469_p1 = pneg %p3468_p0 }
  0x72   : > { %p3474_p6 = pnand %p3473_p4, %p3469_p1 }
  0x74   : > { %3477 = shalt.err (!%p3474_p6)
}
  0x75   : > { %s4298_s1 = smov 4   ;;  %s4299_s23 = smov 64  }
  0x76   : > { %3270 = dma.hbm_to_vmem [thread:$0]  (!%p3711_p8), %s617_s27, 4096, %s619_s7, %s607_s0, %s4299_s23, %s4299_s23, %s4298_s1  }
  0x77   : > { %648 = sbr.rel (%p3743_p5) target bundleno = 2442 (0x98a), region = 88  ;;  %s650_s14 = sand.u32 (!%p3743_p5), 1, %s3559_s25  }
  0x78   : > { %s3244_s18 = smul.u32 (!%p3743_p5), 384, %s650_s14  ;;  %s651_s29 = scalar_lea.sflag (!%p3743_p5), [#allocation4], %s650_s14 }
  0x7a   : > { %s3801_s21 = scalar_lea.vmem (!%p3743_p5), [#allocation3], %s3244_s18 }
  0x7c   : > { %3538 = dma.done.wait (%p3704_p7), %s651_s29, 6144  }
  0x7d   : > { %3540 = vsyncadd (%p3704_p7), %s651_s29, 4294961152  ;;  %s660_s20 = sand.u32 1, %s3687_s28   ;;  %s2570_s17 = sshll.u32 %s650_s14, 7 }
  0x7e   : > { %s661_s3 = scalar_lea.sflag [#allocation7], %s660_s20  ;;  %s3808_s7 = scalar_lea.vmem [#allocation6], %s2570_s17 }
  0x7f   : > { %3542 = dma.done.wait (%p3704_p7), %s661_s3, 6144  }
  0x80   : > { %3544 = vsyncadd (%p3704_p7), %s661_s3, 4294961152  ;;  %s2571_s4 = sshll.u32 %s650_s14, 8  ;;  %s681_s0 = scalar_lea.sflag [#allocation10], %s650_s14 }
  0x81   : > { %s3814_s27 = scalar_lea.vmem [#allocation8], %s2571_s4  ;;  %s3816_s22 = scalar_lea.vmem [#allocation9], %s2571_s4 }
  0x82   : > { %3546 = dma.done.wait (%p3704_p7), %s681_s0, 4096  }
  0x83   : > { %3548 = vsyncadd (%p3704_p7), %s681_s0, 4294963200  ;;  %p772_p8 = scmp.lt.s32.totalorder %s3687_s28, 1  ;;  %s4300_s15 = sld [smem:[#allocation28_spill]] }
  0x84   : > { %s4301_s11 = sld [smem:[#allocation29_spill]]  ;;  %p2574_p7 = scmp.ne.s32.totalorder %s3687_s28, 0 }
  0x85   : > { %s3824_s16 = scalar_select %p772_p8, %s3687_s28, 1 }
  0x86   : > { %s4302_s13 = sld [smem:[#allocation30_spill]] }
  0x87   : > { %s3245_s2 = smul.u32 6, %s3824_s16  ;;  %s2573_s3 = sshll.u32 %s3824_s16, 2 }
  0x88   : > { %s3848_s5 = scalar_lea.vmem %s4262_s12, %s2573_s3  ;;  %802 = sbr.rel (%p2574_p7) target bundleno = 420 (0x1a4), region = 108 }
  0x89   : > { %s3842_s17 = scalar_lea.vmem %s4256_s6, %s3245_s2  ;;  %s791_s19 = scalar_lea.vmem %s4300_s15, %s3824_s16 }
  0x8a   : > { %s794_s23 = scalar_lea.vmem %s4301_s11, %s3824_s16  ;;  %s4303_s4 = sld [smem:[#allocation19_spill]] (!%p2574_p7) }
  0x8b   : > { %s4304_s15 = sld [smem:[#allocation22_spill]] (!%p2574_p7) }
  0x8c   : > { %s797_s29 = scalar_lea.vmem %s4302_s13, %s3824_s16  ;;  %s4305_s26 = sld [smem:[#allocation23_spill]] (!%p2574_p7) }
  0x8d   : > { %v3575_v2 = vmov 128.0  }
  0x8e   : > { %3317 = vrcp.f32 %v3575_v2 }
  0x90   : > { %v803_v0 = vld [vmem:[%s4303_s4] sm:$0xff]  ;;  %v804_v1 = vld [vmem:[%s4303_s4 + $0x8] sm:$0xff] }
  0x91   : > { %807 = vadd.xlane.f32.xlu0 %v803_v0  ;;  %v3315_v31 = vld [vmem:[%s4304_s15] ss:$0 sm:$0xff] }
  0x92   : > { %v3316_v34 = vld [vmem:[%s4305_s26] ss:$0 sm:$0xff] }
  0x94   : > { %v3318_v3 = vpop.eup %3317 }
  0x95   : > { %v812_v4 = vmul.f32 128.0, %v3318_v3  ;;  %vm816_vm0 = vweird.f32 %v3318_v3 }
  0x97   : > { %v813_v5 = vsub.f32 1.0, %v812_v4 }
  0x99   : > { %809 = vadd.xlane.f32.xlu0 %v804_v1  ;;  %v814_v6 = vmul.f32 %v3318_v3, %v813_v5 }
  0x9b   : > { %v815_v7 = vadd.f32 %v3318_v3, %v814_v6 }
  0x9d   : > { %v817_v8 = vsel %vm816_vm0, %v3318_v3, %v815_v7 }
 0x104   : > { %v808_v9 = vpop.xlane.xlu0 %807 }
 0x105   : > { %v818_v10 = vmul.f32 %v817_v8, %v808_v9 }
 0x107   : > { %v820_v11 = vsub.f32 %v803_v0, %v818_v10 }
 0x109   : > { %v822_v12 = vmul.f32 %v820_v11, %v820_v11 }
 0x10b   : > { %824 = vadd.xlane.f32.xlu1 %v822_v12 }
 0x10c   : > { %v810_v13 = vpop.xlane.xlu0 %809 }
 0x10d   : > { %v819_v14 = vmul.f32 %v817_v8, %v810_v13 }
 0x10f   : > { %v821_v15 = vsub.f32 %v804_v1, %v819_v14 }
 0x111   : > { %v823_v16 = vmul.f32 %v821_v15, %v821_v15 }
 0x113   : > { %826 = vadd.xlane.f32.xlu1 %v823_v16 }
 0x17e   : > { %v825_v17 = vpop.xlane.xlu1 %824 }
 0x17f   : > { %v828_v18 = vmul.f32 %v825_v17, %v817_v8 }
 0x181   : > { %v830_v19 = vadd.f32 1e-05, %v828_v18 }
 0x183   : > { %3319 = vrsqrt.f32 %v830_v19  ;;  %vm838_vm2 = vweird.f32 %v830_v19 }
 0x186   : > { %v827_v20 = vpop.xlane.xlu1 %826 }
 0x187   : > { %v829_v21 = vmul.f32 %v827_v20, %v817_v8 }
 0x189   : > { %v3320_v22 = vpop.eup %3319  ;;  %v831_v23 = vadd.f32 1e-05, %v829_v21 }
 0x18a   : > { %v833_v24 = vmul.f32 %v3320_v22, %v830_v19  ;;  %vm839_vm1 = vweird.f32 %v3320_v22 }
 0x18b   : > { %3321 = vrsqrt.f32 %v831_v23  ;;  %vm840_vm3 = vmor %vm838_vm2, %vm839_vm1  ;;  %vm848_vm5 = vweird.f32 %v831_v23 }
 0x18c   : > { %v834_v25 = vmul.f32 %v3320_v22, %v833_v24 }
 0x18e   : > { %v835_v26 = vmul.f32 0.5, %v834_v25 }
 0x190   : > { %v836_v27 = vsub.f32 1.5, %v835_v26 }
 0x191   : > { %v3322_v28 = vpop.eup %3321 }
 0x192   : > { %v837_v29 = vmul.f32 %v3320_v22, %v836_v27  ;;  %v843_v30 = vmul.f32 %v3322_v28, %v831_v23  ;;  %vm849_vm4 = vweird.f32 %v3322_v28 }
 0x193   : > { %vm850_vm6 = vmor %vm848_vm5, %vm849_vm4 }
 0x194   : > { %v841_v32 = vsel %vm840_vm3, %v3320_v22, %v837_v29  ;;  %v844_v33 = vmul.f32 %v3322_v28, %v843_v30 }
 0x195   : > { %v852_v35 = vmul.f32 %v841_v32, %v820_v11 }
 0x196   : > { %v845_v36 = vmul.f32 0.5, %v844_v33 }
 0x197   : > { %v857_v37 = vmul.f32 %v3315_v31, %v852_v35 }
 0x198   : > { %v846_v38 = vsub.f32 1.5, %v845_v36 }
 0x199   : > { %v862_v39 = vadd.f32 %v3316_v34, %v857_v37 }
 0x19a   : > { %v847_v40 = vmul.f32 %v3322_v28, %v846_v38 }
 0x19b   : > { %864 = vst [vmem:[#allocation2] sm:$0xff] %v862_v39 }
 0x19c   : > { %v851_v41 = vsel %vm850_vm6, %v3322_v28, %v847_v40 }
 0x19d   : > { %v853_v42 = vmul.f32 %v851_v41, %v821_v15 }
 0x19f   : > { %v858_v43 = vmul.f32 %v3315_v31, %v853_v42 }
 0x1a1   : > { %v863_v44 = vadd.f32 %v3316_v34, %v858_v43 }
 0x1a3   : > { %865 = vst [vmem:[#allocation2 + $0x8] sm:$0xff] %v863_v44 }
 0x1a4 PF: > { %v2753_v45 = vld [vmem:[%s3801_s21 + $0x158] sm:$0xf]  ;;  %v3160_v46 = vld [vmem:[%s3801_s21 + $0x16c] sm:$0xf0]  ;;  %v2729_v47 = vld [vmem:[%s3801_s21 + $0x128] sm:$0xf]  ;;  %s4307_s3 = scalar_lea.vmem %s4258_s8, %s3824_s16  ;;  %s4308_s0 = scalar_lea.vmem %s4259_s9, %s3824_s16 }
 0x1a5   : > { %v2754_v48 = vor.u32 %v3160_v46, %v2753_v45  ;;  %v3154_v49 = vld [vmem:[%s3801_s21 + $0x13c] sm:$0xf0]  ;;  %v3157_v50 = vld [vmem:[%s3801_s21 + $0x15c] sm:$0xf]  ;;  %v2755_v51 = vld [vmem:[%s3801_s21 + $0x170] sm:$0xf0]  ;;  %s4309_s15 = scalar_lea.vmem %s4260_s10, %s3824_s16 }
 0x1a6   : > { %v2730_v52 = vor.u32 %v3154_v49, %v2729_v47  ;;  %v2705_v53 = vld [vmem:[%s3801_s21 + $0xf8] sm:$0xf]  ;;  %v2758_v54 = vor.u32 %v3157_v50, %v2755_v51  ;;  %v3151_v55 = vld [vmem:[%s3801_s21 + $0x12c] sm:$0xf]  ;;  %v2731_v56 = vld [vmem:[%s3801_s21 + $0x140] sm:$0xf0] }
 0x1a7   : > { %1201 = vmatpush.bf16.msra.mxu2 %v2754_v48  ;;  %v3148_v57 = vld [vmem:[%s3801_s21 + $0x10c] sm:$0xf0]  ;;  %v3159_v59 = vld [vmem:[%s3801_s21 + $0x164] sm:$0xf0]  ;;  %v2734_v60 = vor.u32 %v3151_v55, %v2731_v56  ;;  %v3145_v62 = vld [vmem:[%s3801_s21 + $0xfc] sm:$0xf] }
 0x1a8   : > { %v2745_v58 = vld [vmem:[%s3801_s21 + $0x150] sm:$0xf]  ;;  %1215 = vmatpush.bf16.msra.mxu3 %v2758_v54  ;;  %v2707_v63 = vld [vmem:[%s3801_s21 + $0x110] sm:$0xf0]  ;;  %v2721_v0 = vld [vmem:[%s3801_s21 + $0x120] sm:$0xf]  ;;  %v2706_v2 = vor.u32 %v3148_v57, %v2705_v53 }
 0x1a9   : > { %v2746_v61 = vor.u32 %v3159_v59, %v2745_v58  ;;  %v3153_v1 = vld [vmem:[%s3801_s21 + $0x134] sm:$0xf0]  ;;  %v2681_v3 = vld [vmem:[%s3801_s21 + $0xc8] sm:$0xf]  ;;  %v3142_v5 = vld [vmem:[%s3801_s21 + $0xdc] sm:$0xf0]  ;;  %v2710_v8 = vor.u32 %v3145_v62, %v2707_v63 }
 0x1aa   : > { %v2722_v4 = vor.u32 %v3153_v1, %v2721_v0  ;;  %v2697_v6 = vld [vmem:[%s3801_s21 + $0xf0] sm:$0xf]  ;;  %v3147_v7 = vld [vmem:[%s3801_s21 + $0x104] sm:$0xf0]  ;;  %v3139_v9 = vld [vmem:[%s3801_s21 + $0xcc] sm:$0xf]  ;;  %v2682_v11 = vor.u32 %v3142_v5, %v2681_v3 }
 0x1ab   : > { %1202 = vmatpush.bf16.msra.mxu2 %v2730_v52  ;;  %1173 = vmatpush.bf16.msra.mxu0 %v2746_v61  ;;  %v2683_v10 = vld [vmem:[%s3801_s21 + $0xe0] sm:$0xf0]  ;;  %v2657_v12 = vld [vmem:[%s3801_s21 + $0x98] sm:$0xf]  ;;  %v3136_v13 = vld [vmem:[%s3801_s21 + $0xac] sm:$0xf0]  ;;  %v2698_v14 = vor.u32 %v3147_v7, %v2697_v6 }
 0x1ac   : > { %1216 = vmatpush.bf16.msra.mxu3 %v2734_v60  ;;  %v2673_v15 = vld [vmem:[%s3801_s21 + $0xc0] sm:$0xf]  ;;  %v3141_v16 = vld [vmem:[%s3801_s21 + $0xd4] sm:$0xf0]  ;;  %v3156_v17 = vld [vmem:[%s3801_s21 + $0x154] sm:$0xf]  ;;  %v2686_v18 = vor.u32 %v3139_v9, %v2683_v10  ;;  %v2658_v23 = vor.u32 %v3136_v13, %v2657_v12 }
 0x1ad   : > { %v2747_v19 = vld [vmem:[%s3801_s21 + $0x168] sm:$0xf0]  ;;  %v3133_v20 = vld [vmem:[%s3801_s21 + $0x9c] sm:$0xf]  ;;  %v2659_v21 = vld [vmem:[%s3801_s21 + $0xb0] sm:$0xf0]  ;;  %v2674_v25 = vor.u32 %v3141_v16, %v2673_v15 }
 0x1ae   : > { %v2750_v22 = vor.u32 %v3156_v17, %v2747_v19  ;;  %v2633_v24 = vld [vmem:[%s3801_s21 + $0x68] sm:$0xf]  ;;  %v3150_v26 = vld [vmem:[%s3801_s21 + $0x124] sm:$0xf]  ;;  %v2723_v27 = vld [vmem:[%s3801_s21 + $0x138] sm:$0xf0]  ;;  %v2662_v32 = vor.u32 %v3133_v20, %v2659_v21 }
 0x1af   : > { %1203 = vmatpush.bf16.msra.mxu2 %v2706_v2  ;;  %1174 = vmatpush.bf16.msra.mxu0 %v2722_v4  ;;  %v3130_v28 = vld [vmem:[%s3801_s21 + $0x7c] sm:$0xf0]  ;;  %v2649_v29 = vld [vmem:[%s3801_s21 + $0x90] sm:$0xf]  ;;  %v3135_v30 = vld [vmem:[%s3801_s21 + $0xa4] sm:$0xf0]  ;;  %v2726_v31 = vor.u32 %v3150_v26, %v2723_v27 }
 0x1b0   : > { %1217 = vmatpush.bf16.msra.mxu3 %v2710_v8  ;;  %1187 = vmatpush.bf16.msra.mxu1 %v2750_v22  ;;  %v3144_v33 = vld [vmem:[%s3801_s21 + $0xf4] sm:$0xf]  ;;  %v2699_v34 = vld [vmem:[%s3801_s21 + $0x108] sm:$0xf0]  ;;  %v2635_v36 = vld [vmem:[%s3801_s21 + $0x80] sm:$0xf0]  ;;  %v2634_v37 = vor.u32 %v3130_v28, %v2633_v24  ;;  %v2650_v39 = vor.u32 %v3135_v30, %v2649_v29 }
 0x1b1   : > { %v3127_v35 = vld [vmem:[%s3801_s21 + $0x6c] sm:$0xf]  ;;  %v2609_v38 = vld [vmem:[%s3801_s21 + $0x38] sm:$0xf]  ;;  %v3124_v40 = vld [vmem:[%s3801_s21 + $0x4c] sm:$0xf0]  ;;  %v2702_v43 = vor.u32 %v3144_v33, %v2699_v34 }
 0x1b2   : > { %v2625_v41 = vld [vmem:[%s3801_s21 + $0x60] sm:$0xf]  ;;  %v3129_v42 = vld [vmem:[%s3801_s21 + $0x74] sm:$0xf0]  ;;  %v2638_v44 = vor.u32 %v3127_v35, %v2635_v36  ;;  %v3121_v45 = vld [vmem:[%s3801_s21 + $0x3c] sm:$0xf]  ;;  %v2610_v51 = vor.u32 %v3124_v40, %v2609_v38 }
 0x1b3   : > { %1204 = vmatpush.bf16.msra.mxu2 %v2682_v11  ;;  %1175 = vmatpush.bf16.msra.mxu0 %v2698_v14  ;;  %v3138_v46 = vld [vmem:[%s3801_s21 + $0xc4] sm:$0xf]  ;;  %v2675_v47 = vld [vmem:[%s3801_s21 + $0xd8] sm:$0xf0]  ;;  %v2585_v48 = vld [vmem:[%s3801_s21 + $0x8] sm:$0xf]  ;;  %v2626_v52 = vor.u32 %v3129_v42, %v2625_v41 }
 0x1b4   : > { %1218 = vmatpush.bf16.msra.mxu3 %v2686_v18  ;;  %1188 = vmatpush.bf16.msra.mxu1 %v2726_v31  ;;  %v3118_v49 = vld [vmem:[%s3801_s21 + $0x1c] sm:$0xf0]  ;;  %v2611_v50 = vld [vmem:[%s3801_s21 + $0x50] sm:$0xf0]  ;;  %v2601_v53 = vld [vmem:[%s3801_s21 + $0x30] sm:$0xf]  ;;  %v2678_v55 = vor.u32 %v3138_v46, %v2675_v47 }
 0x1b5   : > { %v3123_v54 = vld [vmem:[%s3801_s21 + $0x44] sm:$0xf0]  ;;  %v2614_v56 = vor.u32 %v3121_v45, %v2611_v50  ;;  %v3132_v57 = vld [vmem:[%s3801_s21 + $0x94] sm:$0xf]  ;;  %v2651_v58 = vld [vmem:[%s3801_s21 + $0xa8] sm:$0xf0]  ;;  %v2586_v61 = vor.u32 %v3118_v49, %v2585_v48 }
 0x1b6   : > { %v3115_v59 = vld [vmem:[%s3801_s21 + $0xc] sm:$0xf]  ;;  %v2587_v60 = vld [vmem:[%s3801_s21 + $0x20] sm:$0xf0]  ;;  %v3931_v62 = vld [vmem:[#allocation2] sm:$0xff]  ;;  %v2602_v0 = vor.u32 %v3123_v54, %v2601_v53  ;;  %v2654_v3 = vor.u32 %v3132_v57, %v2651_v58  ;;  %s4306_s30 = sld [smem:[#allocation20_spill]] }
 0x1b7   : > { %1205 = vmatpush.bf16.msra.mxu2 %v2658_v23  ;;  %1176 = vmatpush.bf16.msra.mxu0 %v2674_v25  ;;  %v3933_v63 = vld [vmem:[#allocation2 + $0x8] sm:$0xff]  ;;  %v2577_v1 = vld [vmem:[%s3801_s21] sm:$0xf]  ;;  %v2590_v4 = vor.u32 %v3115_v59, %v2587_v60  ;;  %v3126_v5 = vld [vmem:[%s3801_s21 + $0x64] sm:$0xf]  ;;  %vm1274_vm7 = vcmask 130048  }
 0x1b8   : > { %1219 = vmatpush.bf16.msra.mxu3 %v2662_v32  ;;  %1189 = vmatpush.bf16.msra.mxu1 %v2702_v43  ;;  %v3117_v2 = vld [vmem:[%s3801_s21 + $0x14] sm:$0xf0]  ;;  %v2627_v6 = vld [vmem:[%s3801_s21 + $0x78] sm:$0xf0]  ;;  %v3941_v7 = vpack.c.bf16 %v3933_v63, %v3931_v62  ;;  %v3120_v10 = vld [vmem:[%s3801_s21 + $0x34] sm:$0xf] }
 0x1b9   : > { %v2578_v8 = vor.u32 %v3117_v2, %v2577_v1  ;;  %v2630_v9 = vor.u32 %v3126_v5, %v2627_v6  ;;  %v2603_v11 = vld [vmem:[%s3801_s21 + $0x48] sm:$0xf0]  ;;  %v3114_v13 = vld [vmem:[%s3801_s21 + $0x4] sm:$0xf]  ;;  %v2579_v14 = vld [vmem:[%s3801_s21 + $0x18] sm:$0xf0] }
 0x1ba   : > { %v2606_v12 = vor.u32 %v3120_v10, %v2603_v11  ;;  %v2582_v15 = vor.u32 %v3114_v13, %v2579_v14  ;;  %v3952_v18 = vld [vmem:[%s3842_s17] sm:$0x3f]  ;;  %v2761_v41 = vld [vmem:[%s3801_s21 + $0x160] sm:$0xf]  ;;  %v3161_v42 = vld [vmem:[%s3801_s21 + $0x174] sm:$0xf0] }
 0x1bb   : > { %1206 = vmatpush.bf16.msra.mxu2 %v2634_v37  ;;  %1177 = vmatpush.bf16.msra.mxu0 %v2650_v39  ;;  %v923_v20 = vperm.slane %v3952_v18, 2  ;;  %v924_v21 = vperm.slane %v3952_v18, 3  ;;  %v921_v26 = vperm.slane %v3952_v18, 0  ;;  %v922_v36 = vperm.slane %v3952_v18, 1  ;;  %v2737_v43 = vld [vmem:[%s3801_s21 + $0x130] sm:$0xf] }
 0x1bc   : > { %1220 = vmatpush.bf16.msra.mxu3 %v2638_v44  ;;  %1190 = vmatpush.bf16.msra.mxu1 %v2678_v55  ;;  %v2762_v44 = vor.u32 %v3161_v42, %v2761_v41  ;;  %v3155_v45 = vld [vmem:[%s3801_s21 + $0x144] sm:$0xf0]  ;;  %v868_v46 = vld [vmem:[%s4306_s30] sm:$0xff]  ;;  %v3158_v48 = vld [vmem:[%s3801_s21 + $0x164] sm:$0xf]  ;;  %p3105_p10 = scmp.ne.s32.totalorder %s3687_s28, 1 }
 0x1bd   : > { %v2738_v47 = vor.u32 %v3155_v45, %v2737_v43  ;;  %v2763_v49 = vld [vmem:[%s3801_s21 + $0x178] sm:$0xf0]  ;;  %v3152_v54 = vld [vmem:[%s3801_s21 + $0x134] sm:$0xf]  ;;  %v3146_v60 = vld [vmem:[%s3801_s21 + $0x104] sm:$0xf] }
 0x1be   : > { %v2766_v53 = vor.u32 %v3158_v48, %v2763_v49  ;;  %v3143_v1 = vld [vmem:[%s3801_s21 + $0xe4] sm:$0xf0]  ;;  %v869_v2 = vld [vmem:[%s4306_s30 + $0x8] sm:$0xff]  ;;  %v3140_v5 = vld [vmem:[%s3801_s21 + $0xd4] sm:$0xf] }
 0x1bf   : > { %1207 = vmatpush.bf16.msra.mxu2 %v2610_v51  ;;  %1178 = vmatpush.bf16.msra.mxu0 %v2626_v52  ;;  %v2713_v51 = vld [vmem:[%s3801_s21 + $0x100] sm:$0xf]  ;;  %v3149_v52 = vld [vmem:[%s3801_s21 + $0x114] sm:$0xf0]  ;;  %v2691_v6 = vld [vmem:[%s3801_s21 + $0xe8] sm:$0xf0] }
 0x1c0   : > { %1221 = vmatpush.bf16.msra.mxu3 %v2614_v56  ;;  %1191 = vmatpush.bf16.msra.mxu1 %v2654_v3  ;;  %v2739_v56 = vld [vmem:[%s3801_s21 + $0x148] sm:$0xf0]  ;;  %v2714_v59 = vor.u32 %v3149_v52, %v2713_v51  ;;  %v3137_v10 = vld [vmem:[%s3801_s21 + $0xb4] sm:$0xf0] }
 0x1c1   : > { %v2742_v57 = vor.u32 %v3152_v54, %v2739_v56  ;;  %v2595_v41 = vld [vmem:[%s3801_s21 + $0x28] sm:$0xf0] }
 0x1c3   : > { %1208 = vmatpush.bf16.msra.mxu2 %v2586_v61  ;;  %1179 = vmatpush.bf16.msra.mxu0 %v2602_v0  ;;  %v2715_v61 = vld [vmem:[%s3801_s21 + $0x118] sm:$0xf0]  ;;  %v2689_v0 = vld [vmem:[%s3801_s21 + $0xd0] sm:$0xf] }
 0x1c4   : > { %1222 = vmatpush.bf16.msra.mxu3 %v2590_v4  ;;  %1192 = vmatpush.bf16.msra.mxu1 %v2630_v9  ;;  %v2718_v3 = vor.u32 %v3146_v60, %v2715_v61  ;;  %v2690_v4 = vor.u32 %v3143_v1, %v2689_v0  ;;  %v2665_v9 = vld [vmem:[%s3801_s21 + $0xa0] sm:$0xf]  ;;  %v925_v1 = vperm.slane %v3952_v18, 4 }
 0x1c5   : > { %v2666_v14 = vor.u32 %v3137_v10, %v2665_v9 }
 0x1c6   : > { %1209 = vmatmul.bf16.vlgmr.msra.gmra.mxu2 %v3941_v7 }
 0x1c7   : > { %1180 = vmatpush.bf16.msra.mxu0 %v2578_v8  ;;  %1223 = vmatmul.bf16.vlgmr.msra.gmra.mxu3 %v3941_v7 }
 0x1c8   : > { %1193 = vmatpush.bf16.msra.mxu1 %v2606_v12  ;;  %v2694_v12 = vor.u32 %v3140_v5, %v2691_v6 }
 0x1ca   : > { %1181 = vmatmul.bf16.vlgmr.msra.gmra.mxu0 %v3941_v7 }
 0x1cb   : > { %1229 = vmatpush.bf16.msrb.mxu0 %v2762_v44 }
 0x1cc   : > { %1194 = vmatpush.bf16.msra.mxu1 %v2582_v15  ;;  %v3134_v15 = vld [vmem:[%s3801_s21 + $0xa4] sm:$0xf] }
 0x1cf   : > { %1195 = vmatmul.bf16.vlgmr.msra.gmra.mxu1 %v3941_v7  ;;  %1230 = vmatpush.bf16.msrb.mxu0 %v2738_v47 }
 0x1d0   : > { %1243 = vmatpush.bf16.msrb.mxu1 %v2766_v53 }
 0x1d3   : > { %1231 = vmatpush.bf16.msrb.mxu0 %v2714_v59 }
 0x1d4   : > { %1244 = vmatpush.bf16.msrb.mxu1 %v2742_v57 }
 0x1d7   : > { %1232 = vmatpush.bf16.msrb.mxu0 %v2690_v4 }
 0x1d8   : > { %1245 = vmatpush.bf16.msrb.mxu1 %v2718_v3 }
 0x1db   : > { %1233 = vmatpush.bf16.msrb.mxu0 %v2666_v14  ;;  %v3169_v14 = vld [vmem:[%s3808_s7 + $0x38] sm:$0xff] }
 0x1dc   : > { %1246 = vmatpush.bf16.msrb.mxu1 %v2694_v12 }
 0x247   : > { %v1182_v17 = vpop.f32.mrf.mxu0 }
 0x248   : > { %v1183_v32 = vadd.f32 %v1182_v17, %v921_v26  ;;  %v2641_v17 = vld [vmem:[%s3801_s21 + $0x70] sm:$0xf] }
 0x249   : > { %v1210_v16 = vpop.f32.mrf.mxu2 }
 0x24a   : > { %v1224_v19 = vpop.f32.mrf.mxu3  ;;  %v1211_v23 = vadd.f32 %v1210_v16, %v923_v20  ;;  %v2667_v16 = vld [vmem:[%s3801_s21 + $0xb8] sm:$0xf0] }
 0x24b   : > { %v1225_v25 = vadd.f32 %v1224_v19, %v924_v21  ;;  %v3131_v19 = vld [vmem:[%s3801_s21 + $0x84] sm:$0xf0] }
 0x24c   : > { %v1196_v34 = vpop.f32.mrf.mxu1 }
 0x24d   : > { %v1197_v38 = vadd.f32 %v1196_v34, %v922_v36 }
 0x24f   : > { %v1184_v29 = vpop.f32.mrf.mxu0 }
 0x250   : > { %v1185_v33 = vadd.f32 %v1184_v29, %v921_v26  ;;  %v3125_v26 = vld [vmem:[%s3801_s21 + $0x54] sm:$0xf0] }
 0x251   : > { %v1212_v22 = vpop.f32.mrf.mxu2 }
 0x252   : > { %v1213_v24 = vadd.f32 %v1212_v22, %v923_v20  ;;  %v1226_v27 = vpop.f32.mrf.mxu3  ;;  %v1257_v35 = vpack.c.bf16 %v1185_v33, %v1183_v32  ;;  %v2670_v20 = vor.u32 %v3134_v15, %v2667_v16  ;;  %v3128_v22 = vld [vmem:[%s3801_s21 + $0x74] sm:$0xf]  ;;  %v3119_v32 = vld [vmem:[%s3801_s21 + $0x24] sm:$0xf0]  ;;  %v3177_v15 = vld [vmem:[%s3808_s7 + $0x78] sm:$0xff] }
 0x253   : > { %v1227_v30 = vadd.f32 %v1226_v27, %v924_v21  ;;  %v2642_v21 = vor.u32 %v3131_v19, %v2641_v17  ;;  %v3168_v16 = vld [vmem:[%s3808_s7 + $0x30] sm:$0xff]  ;;  %v3167_v19 = vld [vmem:[%s3808_s7 + $0x28] sm:$0xff] }
 0x254   : > { %v1258_v28 = vpack.c.bf16 %v1213_v24, %v1211_v23  ;;  %v1198_v37 = vpop.f32.mrf.mxu1  ;;  %v2643_v23 = vld [vmem:[%s3801_s21 + $0x88] sm:$0xf0]  ;;  %1247 = vmatpush.bf16.msrb.mxu1 %v2670_v20  ;;  %v3166_v20 = vld [vmem:[%s3808_s7 + $0x20] sm:$0xff] }
 0x255   : > { %v1333_v31 = vpack.c.bf16 %v1227_v30, %v1225_v25  ;;  %v1199_v39 = vadd.f32 %v1198_v37, %v922_v36  ;;  %v2617_v25 = vld [vmem:[%s3801_s21 + $0x40] sm:$0xf]  ;;  %1234 = vmatpush.bf16.msrb.mxu0 %v2642_v21  ;;  %v3122_v37 = vld [vmem:[%s3801_s21 + $0x44] sm:$0xf] }
 0x256   : > { %1267 = vmatpush.bf16.xpose.msrb.mxu2 %v1258_v28  ;;  %v2646_v28 = vor.u32 %v3128_v22, %v2643_v23  ;;  %v2618_v30 = vor.u32 %v3125_v26, %v2617_v25  ;;  %v3165_v25 = vld [vmem:[%s3808_s7 + $0x18] sm:$0xff] }
 0x257   : > { %v1332_v40 = vpack.c.bf16 %v1199_v39, %v1197_v38  ;;  %v2619_v38 = vld [vmem:[%s3801_s21 + $0x58] sm:$0xf0]  ;;  %v3116_v39 = vld [vmem:[%s3801_s21 + $0x14] sm:$0xf] }
 0x258   : > { %1248 = vmatpush.bf16.msrb.mxu1 %v2646_v28  ;;  %v2598_v42 = vor.u32 %v3116_v39, %v2595_v41  ;;  %v3173_v39 = vld [vmem:[%s3808_s7 + $0x58] sm:$0xff]  ;;  %v3171_v41 = vld [vmem:[%s3808_s7 + $0x48] sm:$0xff] }
 0x259   : > { %1235 = vmatpush.bf16.msrb.mxu0 %v2618_v30 }
 0x25d   : > { %1268 = vmatmul.bf16.vlgmr.msrb.gmra.mxu2 %v1257_v35 }
 0x25e   : > { %1342 = vmatpush.bf16.xpose.msra.mxu2 %v1333_v31  ;;  %v2593_v31 = vld [vmem:[%s3801_s21 + $0x10] sm:$0xf] }
 0x25f   : > { %v2594_v33 = vor.u32 %v3119_v32, %v2593_v31 }
 0x261   : > { %1236 = vmatpush.bf16.msrb.mxu0 %v2594_v33  ;;  %v3176_v33 = vld [vmem:[%s3808_s7 + $0x70] sm:$0xff] }
 0x264   : > { %1237 = vmatmul.bf16.vlgmr.msrb.gmra.mxu0 %v3941_v7 }
 0x265   : > { %1455 = vmatpush.bf16.msra.mxu0 %v3177_v15  ;;  %v2965_v15 = vld [vmem:[%s3814_s27 + $0xf0] sm:$0xf0] }
 0x269   : > { %1456 = vmatpush.bf16.msra.mxu0 %v3176_v33  ;;  %v2957_v33 = vld [vmem:[%s3814_s27 + $0xd8] sm:$0xf0] }
 0x26d   : > { %1343 = vmatmul.bf16.vlgmr.msra.gmra.mxu2 %v1332_v40  ;;  %v2622_v40 = vor.u32 %v3122_v37, %v2619_v38  ;;  %v3174_v37 = vld [vmem:[%s3808_s7 + $0x60] sm:$0xff] }
 0x26e   : > { %v3162_v38 = vld [vmem:[%s3808_s7] sm:$0xff] }
 0x26f   : > { %1249 = vmatpush.bf16.msrb.mxu1 %v2622_v40  ;;  %v3172_v40 = vld [vmem:[%s3808_s7 + $0x50] sm:$0xff] }
 0x273   : > { %1250 = vmatpush.bf16.msrb.mxu1 %v2598_v42  ;;  %v3170_v42 = vld [vmem:[%s3808_s7 + $0x40] sm:$0xff] }
 0x276   : > { %1251 = vmatmul.bf16.vlgmr.msrb.gmra.mxu1 %v3941_v7 }
 0x277   : > { %1517 = vmatpush.bf16.msra.mxu1 %v3169_v14 }
 0x27b   : > { %1518 = vmatpush.bf16.msra.mxu1 %v3168_v16  ;;  %v2971_v16 = vld [vmem:[%s3814_s27 + $0xe8] sm:$0xf] }
 0x27f   : > { %1519 = vmatpush.bf16.msra.mxu1 %v3167_v19 }
 0x283   : > { %1520 = vmatpush.bf16.msra.mxu1 %v3166_v20  ;;  %v3207_v20 = vld [vmem:[%s3814_s27 + $0xec] sm:$0xf] }
 0x287   : > { %1521 = vmatpush.bf16.msra.mxu1 %v3165_v25  ;;  %v3202_v25 = vld [vmem:[%s3814_s27 + $0xc4] sm:$0xf] }
 0x2e0   : > { %v1269_v50 = vpop.f32.mrf.mxu2 }
 0x2e1   : > { %v3970_v55 = vadd.f32 %v1269_v50, %v868_v46  ;;  %v1238_v0 = vpop.f32.mrf.mxu0 }
 0x2e2   : > { %v1239_v3 = vadd.f32 %v1238_v0, %v925_v1 }
 0x2e3   : > { %v1275_v58 = vsel %vm1274_vm7, %v3970_v55, -inf }
 0x2e4   : > { %1276 = vmax.xlane.f32.xlu0 %v1275_v58 }
 0x2e8   : > { %v1271_v8 = vpop.f32.mrf.mxu2 }
 0x2e9   : > { %v1272_v11 = vadd.f32 %v1271_v8, %v869_v2  ;;  %v926_v8 = vperm.slane %v3952_v18, 5 }
 0x2eb   : > { %v1278_v13 = vsel %vm1274_vm7, %v1272_v11, -inf }
 0x2ec   : > { %1279 = vmax.xlane.f32.xlu0 %v1278_v13 }
 0x2f0   : > { %v1344_v24 = vpop.f32.mrf.mxu2 }
 0x2f1   : > { %v1345_v27 = vadd.f32 %v1344_v24, %v868_v46 }
 0x2f3   : > { %v1349_v29 = vsel %vm1274_vm7, %v1345_v27, -inf  ;;  %v1252_v6 = vpop.f32.mrf.mxu1 }
 0x2f4   : > { %1350 = vmax.xlane.f32.xlu1 %v1349_v29  ;;  %v1253_v9 = vadd.f32 %v1252_v6, %v926_v8 }
 0x2f8   : > { %v1346_v34 = vpop.f32.mrf.mxu2 }
 0x2f9   : > { %v1347_v35 = vadd.f32 %v1346_v34, %v869_v2  ;;  %v1240_v2 = vpop.f32.mrf.mxu0  ;;  %v3164_v34 = vld [vmem:[%s3808_s7 + $0x10] sm:$0xff] }
 0x2fa   : > { %v1241_v4 = vadd.f32 %v1240_v2, %v925_v1  ;;  %1522 = vmatpush.bf16.msra.mxu1 %v3164_v34 }
 0x2fb   : > { %v1352_v36 = vsel %vm1274_vm7, %v1347_v35, -inf  ;;  %v1254_v10 = vpop.f32.mrf.mxu1 }
 0x2fc   : > { %1353 = vmax.xlane.f32.xlu1 %v1352_v36  ;;  %v1259_v5 = vpack.c.bf16 %v1241_v4, %v1239_v3  ;;  %v3163_v36 = vld [vmem:[%s3808_s7 + $0x8] sm:$0xff] }
 0x2fe   : > { %1308 = vmatpush.bf16.msrb.mxu3 %v1259_v5  ;;  %1523 = vmatpush.bf16.msra.mxu1 %v3163_v36  ;;  %v3200_v36 = vld [vmem:[%s3814_s27 + $0xac] sm:$0xf0] }
 0x302   : > { %1524 = vmatpush.bf16.msra.mxu1 %v3162_v38 }
 0x357   : > { %v1277_v43 = vpop.xlane.xlu0 %1276 }
 0x358   : > { %v1281_v44 = vsub.f32 %v3970_v55, %v1277_v43 }
 0x35a   : > { %v1283_v45 = vmul.f32 1.442695, %v1281_v44 }
 0x35c   : > { %3329 = vpow2.f32 %v1283_v45 }
 0x35f   : > { %v1280_v46 = vpop.xlane.xlu0 %1279 }
 0x360   : > { %v1282_v47 = vsub.f32 %v1272_v11, %v1280_v46  ;;  %v1255_v11 = vadd.f32 %v1254_v10, %v926_v8 }
 0x362   : > { %v3330_v48 = vpop.eup %3329  ;;  %v1285_v49 = vmul.f32 1.442695, %v1282_v47  ;;  %v1334_v12 = vpack.c.bf16 %v1255_v11, %v1253_v9  ;;  %v2963_v11 = vld [vmem:[%s3814_s27 + $0xe0] sm:$0xf] }
 0x363   : > { %v1287_v50 = vsel %vm1274_vm7, %v3330_v48, 0.0 }
 0x364   : > { %3331 = vpow2.f32 %v1285_v49  ;;  %1288 = vadd.xlane.f32.xlu2 %v1287_v50  ;;  %1382 = vmatpush.bf16.msra.mxu3 %v1334_v12  ;;  %v3323_v50 = vld [vmem:[%s4307_s3] ss:$0 sm:$0xff] }
 0x365   : > { %v3208_v12 = vld [vmem:[%s3814_s27 + $0xec] sm:$0xf0] }
 0x366   : > { %v2964_v14 = vor.u32 %v3208_v12, %v2963_v11  ;;  %v3188_v11 = vld [vmem:[%s3814_s27 + $0x4c] sm:$0xf0]  ;;  %v3186_v12 = vld [vmem:[%s3814_s27 + $0x44] sm:$0xf] }
 0x367   : > { %v1351_v51 = vpop.xlane.xlu1 %1350 }
 0x368   : > { %v1355_v52 = vsub.f32 %v1345_v27, %v1351_v51  ;;  %1801 = vmatpush.bf16.msrb.mxu2 %v2964_v14  ;;  %v2885_v14 = vld [vmem:[%s3814_s27 + $0x50] sm:$0xf0] }
 0x36a   : > { %v3332_v53 = vpop.eup %3331  ;;  %v1357_v54 = vmul.f32 1.442695, %v1355_v52 }
 0x36b   : > { %v1290_v56 = vsel %vm1274_vm7, %v3332_v53, 0.0 }
 0x36c   : > { %3333 = vpow2.f32 %v1357_v54  ;;  %1291 = vadd.xlane.f32.xlu2 %v1290_v56 }
 0x36f   : > { %v1354_v7 = vpop.xlane.xlu1 %1353 }
 0x370   : > { %v1356_v55 = vsub.f32 %v1347_v35, %v1354_v7  ;;  %v3175_v35 = vld [vmem:[%s3808_s7 + $0x68] sm:$0xff] }
 0x371   : > { %1457 = vmatpush.bf16.msra.mxu0 %v3175_v35  ;;  %v2931_v35 = vld [vmem:[%s3814_s27 + $0xa0] sm:$0xf] }
 0x372   : > { %v3334_v57 = vpop.eup %3333  ;;  %v1359_v58 = vmul.f32 1.442695, %v1356_v55  ;;  %v2932_v38 = vor.u32 %v3200_v36, %v2931_v35  ;;  %v3180_v36 = vld [vmem:[%s3814_s27 + $0xc] sm:$0xf0] }
 0x373   : > { %v1361_v59 = vsel %vm1274_vm7, %v3334_v57, 0.0 }
 0x374   : > { %3335 = vpow2.f32 %v1359_v58  ;;  %1362 = vadd.xlane.f32.xlu0 %v1361_v59  ;;  %v3576_v59 = vmov 128.0  }
 0x375   : > { %1458 = vmatpush.bf16.msra.mxu0 %v3174_v37  ;;  %v3198_v37 = vld [vmem:[%s3814_s27 + $0xa4] sm:$0xf] }
 0x379   : > { %1459 = vmatpush.bf16.msra.mxu0 %v3173_v39  ;;  %v2933_v39 = vld [vmem:[%s3814_s27 + $0xb0] sm:$0xf0] }
 0x37a   : > { %v3336_v60 = vpop.eup %3335 }
 0x37b   : > { %v1364_v61 = vsel %vm1274_vm7, %v3336_v60, 0.0 }
 0x37c   : > { %1365 = vadd.xlane.f32.xlu1 %v1364_v61 }
 0x37d   : > { %1460 = vmatpush.bf16.msra.mxu0 %v3172_v40  ;;  %v2939_v40 = vld [vmem:[%s3814_s27 + $0xa8] sm:$0xf] }
 0x381   : > { %1461 = vmatpush.bf16.msra.mxu0 %v3171_v41  ;;  %v3201_v41 = vld [vmem:[%s3814_s27 + $0xb4] sm:$0xf0] }
 0x385   : > { %1462 = vmatpush.bf16.msra.mxu0 %v3170_v42  ;;  %v2936_v42 = vor.u32 %v3198_v37, %v2933_v39  ;;  %v3178_v37 = vld [vmem:[%s3814_s27 + $0x4] sm:$0xf] }
 0x3d7   : > { %v1289_v13 = vpop.xlane.xlu2 %1288 }
 0x3d8   : > { %3337 = vrcp.f32 %v1289_v13  ;;  %v3206_v13 = vld [vmem:[%s3814_s27 + $0xe4] sm:$0xf] }
 0x3d9   : > { %v2968_v19 = vor.u32 %v3206_v13, %v2965_v15  ;;  %v2891_v15 = vld [vmem:[%s3814_s27 + $0x48] sm:$0xf] }
 0x3de   : > { %v3338_v18 = vpop.eup %3337 }
 0x3df   : > { %v1292_v17 = vpop.xlane.xlu2 %1291  ;;  %v1295_v22 = vmul.f32 %v3338_v18, %v3330_v48 }
 0x3e0   : > { %3339 = vrcp.f32 %v1292_v17  ;;  %v3209_v17 = vld [vmem:[%s3814_s27 + $0xf4] sm:$0xf0] }
 0x3e1   : > { %v2972_v18 = vor.u32 %v3209_v17, %v2971_v16  ;;  %v3189_v16 = vld [vmem:[%s3814_s27 + $0x54] sm:$0xf0]  ;;  %v2888_v17 = vor.u32 %v3186_v12, %v2885_v14  ;;  %v3232_v14 = vld [vmem:[%s3816_s22 + $0xb0] sm:$0xff] }
 0x3e3   : > { %1829 = vmatpush.bf16.msrb.mxu0 %v2972_v18  ;;  %v3187_v18 = vld [vmem:[%s3814_s27 + $0x4c] sm:$0xf] }
 0x3e6   : > { %v3340_v21 = vpop.eup %3339 }
 0x3e7   : > { %v1296_v23 = vmul.f32 %v3340_v21, %v3332_v53  ;;  %v1363_v26 = vpop.xlane.xlu0 %1362  ;;  %v2973_v21 = vld [vmem:[%s3814_s27 + $0xf8] sm:$0xf0] }
 0x3e8   : > { %3341 = vrcp.f32 %v1363_v26 }
 0x3e9   : > { %v1297_v24 = vpack.c.bf16 %v1296_v23, %v1295_v22  ;;  %v2976_v22 = vor.u32 %v3207_v20, %v2973_v21  ;;  %v2947_v23 = vld [vmem:[%s3814_s27 + $0xc0] sm:$0xf]  ;;  %v2893_v20 = vld [vmem:[%s3814_s27 + $0x58] sm:$0xf0] }
 0x3ea   : > { %v2896_v21 = vor.u32 %v3187_v18, %v2893_v20  ;;  %v3239_v18 = vld [vmem:[%s3816_s22 + $0xe8] sm:$0xff]  ;;  %v3216_v20 = vld [vmem:[%s3816_s22 + $0x30] sm:$0xff] }
 0x3eb   : > { %2767 = vmatmul.msk.bf16.vlgmr.msrb.gmra.mxu3 %vm1274_vm7, %v1297_v24  ;;  %v3204_v24 = vld [vmem:[%s3814_s27 + $0xcc] sm:$0xf0]  ;;  %1843 = vmatpush.bf16.msrb.mxu1 %v2976_v22  ;;  %v2867_v22 = vld [vmem:[%s3814_s27 + $0x20] sm:$0xf] }
 0x3ec   : > { %1815 = vmatpush.bf16.msrb.mxu3 %v2968_v19  ;;  %v2948_v26 = vor.u32 %v3204_v24, %v2947_v23  ;;  %v2892_v19 = vor.u32 %v3189_v16, %v2891_v15  ;;  %v3184_v23 = vld [vmem:[%s3814_s27 + $0x2c] sm:$0xf0]  ;;  %v3182_v24 = vld [vmem:[%s3814_s27 + $0x24] sm:$0xf]  ;;  %v3217_v16 = vld [vmem:[%s3816_s22 + $0x38] sm:$0xff] }
 0x3ed   : > { %v3240_v15 = vld [vmem:[%s3816_s22 + $0xf0] sm:$0xff] }
 0x3ee   : > { %v3342_v28 = vpop.eup %3341  ;;  %1802 = vmatpush.bf16.msrb.mxu2 %v2948_v26  ;;  %v2869_v26 = vld [vmem:[%s3814_s27 + $0x30] sm:$0xf0] }
 0x3ef   : > { %v1366_v27 = vpop.xlane.xlu1 %1365  ;;  %v1369_v30 = vmul.f32 %v3342_v28, %v3334_v57  ;;  %v2955_v28 = vld [vmem:[%s3814_s27 + $0xc8] sm:$0xf] }
 0x3f0   : > { %3343 = vrcp.f32 %v1366_v27  ;;  %v2949_v27 = vld [vmem:[%s3814_s27 + $0xd0] sm:$0xf0] }
 0x3f1   : > { %3345 = vrcp.f32 %v3576_v59  ;;  %v3192_v59 = vld [vmem:[%s3814_s27 + $0x6c] sm:$0xf0] }
 0x3f2   : > { %1803 = vmatpush.bf16.msrb.mxu2 %v2932_v38  ;;  %v2853_v38 = vld [vmem:[%s3814_s27 + $0x10] sm:$0xf0] }
 0x3f6   : > { %v3344_v29 = vpop.eup %3343 }
 0x3f7   : > { %v1370_v31 = vmul.f32 %v3344_v29, %v3336_v60  ;;  %v3346_v60 = vpop.eup %3345  ;;  %v3205_v29 = vld [vmem:[%s3814_s27 + $0xd4] sm:$0xf0] }
 0x3f8   : > { %v1546_v61 = vmul.f32 128.0, %v3346_v60  ;;  %vm1550_vm8 = vweird.f32 %v3346_v60 }
 0x3f9   : > { %v1371_v32 = vpack.c.bf16 %v1370_v31, %v1369_v30  ;;  %v2952_v30 = vor.u32 %v3202_v25, %v2949_v27  ;;  %v2956_v31 = vor.u32 %v3205_v29, %v2955_v28  ;;  %v2868_v25 = vor.u32 %v3184_v23, %v2867_v22  ;;  %v2875_v27 = vld [vmem:[%s3814_s27 + $0x28] sm:$0xf]  ;;  %v3185_v28 = vld [vmem:[%s3814_s27 + $0x34] sm:$0xf0]  ;;  %v3230_v22 = vld [vmem:[%s3816_s22 + $0xa0] sm:$0xff] }
 0x3fa   : > { %v1547_v0 = vsub.f32 1.0, %v1546_v61  ;;  %v2872_v29 = vor.u32 %v3182_v24, %v2869_v26  ;;  %v3238_v23 = vld [vmem:[%s3816_s22 + $0xe0] sm:$0xff]  ;;  %v3215_v24 = vld [vmem:[%s3816_s22 + $0x28] sm:$0xff]  ;;  %v3229_v26 = vld [vmem:[%s3816_s22 + $0x98] sm:$0xff] }
 0x3fb   : > { %2768 = vmatmul.msk.bf16.vlgmr.msra.gmra.mxu3 %vm1274_vm7, %v1371_v32  ;;  %v3203_v32 = vld [vmem:[%s3814_s27 + $0xcc] sm:$0xf]  ;;  %1830 = vmatpush.bf16.msrb.mxu0 %v2956_v31 }
 0x3fc   : > { %v1548_v1 = vmul.f32 %v3346_v60, %v1547_v0  ;;  %v2960_v34 = vor.u32 %v3203_v32, %v2957_v33  ;;  %1816 = vmatpush.bf16.msrb.mxu3 %v2952_v30  ;;  %v2901_v0 = vld [vmem:[%s3814_s27 + $0x70] sm:$0xf0]  ;;  %v2876_v30 = vor.u32 %v3185_v28, %v2875_v27  ;;  %v3183_v31 = vld [vmem:[%s3814_s27 + $0x2c] sm:$0xf]  ;;  %v2877_v32 = vld [vmem:[%s3814_s27 + $0x38] sm:$0xf0] }
 0x3fd   : > { %v2851_v33 = vld [vmem:[%s3814_s27] sm:$0xf]  ;;  %v2880_v35 = vor.u32 %v3183_v31, %v2877_v32  ;;  %v3237_v27 = vld [vmem:[%s3816_s22 + $0xd8] sm:$0xff]  ;;  %v3236_v31 = vld [vmem:[%s3816_s22 + $0xd0] sm:$0xff] }
 0x3fe   : > { %v1549_v2 = vadd.f32 %v3346_v60, %v1548_v1  ;;  %1844 = vmatpush.bf16.msrb.mxu1 %v2960_v34  ;;  %v2907_v1 = vld [vmem:[%s3814_s27 + $0x68] sm:$0xf]  ;;  %v3214_v28 = vld [vmem:[%s3816_s22 + $0x20] sm:$0xff]  ;;  %v4154_v32 = vld [vmem:[%s3848_s5] sm:$0xf] }
 0x400   : > { %1817 = vmatpush.bf16.msrb.mxu3 %v2936_v42  ;;  %v2859_v42 = vld [vmem:[%s3814_s27 + $0x8] sm:$0xf] }
 0x46e   : > { %v1310_v43 = vpop.f32.mrf.mxu3 }
 0x476   : > { %v1312_v44 = vpop.f32.mrf.mxu3 }
 0x477   : > { %v1315_v45 = vpack.c.bf16 %v1312_v44, %v1310_v43  ;;  %v2940_v43 = vor.u32 %v3201_v41, %v2939_v40  ;;  %v3199_v44 = vld [vmem:[%s3814_s27 + $0xac] sm:$0xf]  ;;  %v2852_v40 = vor.u32 %v3180_v36, %v2851_v33  ;;  %v2856_v41 = vor.u32 %v3178_v37, %v2853_v38  ;;  %v3213_v33 = vld [vmem:[%s3816_s22 + $0x18] sm:$0xff] }
 0x478   : > { %v3235_v36 = vld [vmem:[%s3816_s22 + $0xc8] sm:$0xff]  ;;  %v1635_v37 = vperm.slane %v4154_v32, 2  ;;  %v1636_v38 = vperm.slane %v4154_v32, 3 }
 0x479   : > { %1525 = vmatmul.bf16.vlgmr.msra.gmra.mxu1 %v1315_v45  ;;  %v2941_v45 = vld [vmem:[%s3814_s27 + $0xb8] sm:$0xf0]  ;;  %1831 = vmatpush.bf16.msrb.mxu0 %v2940_v43  ;;  %v3181_v43 = vld [vmem:[%s3814_s27 + $0x14] sm:$0xf0] }
 0x47e   : > { %v1384_v46 = vpop.f32.mrf.mxu3 }
 0x486   : > { %v1386_v47 = vpop.f32.mrf.mxu3 }
 0x487   : > { %v1389_v48 = vpack.c.bf16 %v1386_v47, %v1384_v46  ;;  %v2944_v46 = vor.u32 %v3199_v44, %v2941_v45  ;;  %v2915_v47 = vld [vmem:[%s3814_s27 + $0x80] sm:$0xf]  ;;  %v3179_v44 = vld [vmem:[%s3814_s27 + $0xc] sm:$0xf]  ;;  %v2860_v45 = vor.u32 %v3181_v43, %v2859_v42 }
 0x488   : > { %v3226_v43 = vld [vmem:[%s3816_s22 + $0x80] sm:$0xff] }
 0x489   : > { %1463 = vmatmul.bf16.vlgmr.msra.gmra.mxu0 %v1389_v48  ;;  %v3196_v48 = vld [vmem:[%s3814_s27 + $0x8c] sm:$0xf0]  ;;  %1845 = vmatpush.bf16.msrb.mxu1 %v2944_v46  ;;  %v2861_v46 = vld [vmem:[%s3814_s27 + $0x18] sm:$0xf0] }
 0x4f6   : > { %v1526_v49 = vpop.f32.mrf.mxu1 }
 0x4fe   : > { %v1528_v56 = vpop.f32.mrf.mxu1 }
 0x506   : > { %v1464_v51 = vpop.f32.mrf.mxu0 }
 0x507   : > { %v1527_v52 = vadd.f32 %v1526_v49, %v1464_v51  ;;  %v3194_v49 = vld [vmem:[%s3814_s27 + $0x84] sm:$0xf]  ;;  %v2917_v51 = vld [vmem:[%s3814_s27 + $0x90] sm:$0xf0] }
 0x509   : > { %v1535_v53 = vadd.f32 %v3323_v50, %v1527_v52  ;;  %v2923_v52 = vld [vmem:[%s3814_s27 + $0x88] sm:$0xf] }
 0x50b   : > { %v1537_v54 = vadd.f32 %v1535_v53, %v3931_v62  ;;  %v4037_v62 = vsel %vm1550_vm8, %v3346_v60, %v1549_v2  ;;  %v3197_v53 = vld [vmem:[%s3814_s27 + $0x94] sm:$0xf0]  ;;  %v3190_v60 = vld [vmem:[%s3814_s27 + $0x64] sm:$0xf] }
 0x50c   : > { %v3193_v2 = vld [vmem:[%s3814_s27 + $0x74] sm:$0xf0] }
 0x50d   : > { %1541 = vadd.xlane.f32.xlu2 %v1537_v54 }
 0x50e   : > { %v1466_v7 = vpop.f32.mrf.mxu0 }
 0x50f   : > { %v1529_v55 = vadd.f32 %v1528_v56, %v1466_v7  ;;  %v2924_v56 = vor.u32 %v3197_v53, %v2923_v52  ;;  %v3195_v7 = vld [vmem:[%s3814_s27 + $0x8c] sm:$0xf] }
 0x511   : > { %v1536_v57 = vadd.f32 %v3323_v50, %v1529_v55  ;;  %v2916_v50 = vor.u32 %v3196_v48, %v2915_v47  ;;  %v2925_v55 = vld [vmem:[%s3814_s27 + $0x98] sm:$0xf0]  ;;  %1832 = vmatpush.bf16.msrb.mxu0 %v2924_v56  ;;  %v2864_v48 = vor.u32 %v3179_v44, %v2861_v46  ;;  %v3234_v44 = vld [vmem:[%s3816_s22 + $0xc0] sm:$0xff] }
 0x513   : > { %v1538_v58 = vadd.f32 %v1536_v57, %v3933_v63  ;;  %1804 = vmatpush.bf16.msrb.mxu2 %v2916_v50  ;;  %v2928_v57 = vor.u32 %v3195_v7, %v2925_v55 }
 0x515   : > { %1543 = vadd.xlane.f32.xlu0 %v1538_v58  ;;  %1846 = vmatpush.bf16.msrb.mxu1 %v2928_v57 }
 0x580   : > { %v1542_v3 = vpop.xlane.xlu2 %1541 }
 0x581   : > { %v1552_v63 = vmul.f32 %v4037_v62, %v1542_v3  ;;  %v2904_v3 = vor.u32 %v3190_v60, %v2901_v0 }
 0x583   : > { %v4040_v4 = vsub.f32 %v1537_v54, %v1552_v63  ;;  %v2920_v54 = vor.u32 %v3194_v49, %v2917_v51  ;;  %v2908_v63 = vor.u32 %v3193_v2, %v2907_v1  ;;  %v3324_v2 = vld [vmem:[%s4308_s0] ss:$0 sm:$0xff] }
 0x585   : > { %v1556_v5 = vmul.f32 %v4040_v4, %v4040_v4  ;;  %1818 = vmatpush.bf16.msrb.mxu3 %v2920_v54  ;;  %1833 = vmatpush.bf16.msrb.mxu0 %v2908_v63 }
 0x587   : > { %1558 = vadd.xlane.f32.xlu1 %v1556_v5  ;;  %v3191_v5 = vld [vmem:[%s3814_s27 + $0x6c] sm:$0xf] }
 0x588   : > { %v1544_v6 = vpop.xlane.xlu0 %1543 }
 0x589   : > { %v1553_v8 = vmul.f32 %v4037_v62, %v1544_v6  ;;  %v2909_v6 = vld [vmem:[%s3814_s27 + $0x78] sm:$0xf0]  ;;  %1819 = vmatpush.bf16.msrb.mxu3 %v2904_v3  ;;  %1834 = vmatpush.bf16.msrb.mxu0 %v2892_v19  ;;  %v3231_v19 = vld [vmem:[%s3816_s22 + $0xa8] sm:$0xff] }
 0x58b   : > { %v4045_v9 = vsub.f32 %v1538_v58, %v1553_v8  ;;  %v2899_v58 = vld [vmem:[%s3814_s27 + $0x60] sm:$0xf]  ;;  %v2912_v8 = vor.u32 %v3191_v5, %v2909_v6 }
 0x58c   : > { %v2900_v61 = vor.u32 %v3192_v59, %v2899_v58 }
 0x58d   : > { %v1557_v10 = vmul.f32 %v4045_v9, %v4045_v9  ;;  %1847 = vmatpush.bf16.msrb.mxu1 %v2912_v8  ;;  %1820 = vmatpush.bf16.msrb.mxu3 %v2888_v17  ;;  %v3225_v17 = vld [vmem:[%s3816_s22 + $0x78] sm:$0xff] }
 0x58e   : > { %1805 = vmatpush.bf16.msrb.mxu2 %v2900_v61  ;;  %1835 = vmatpush.bf16.msrb.mxu0 %v2876_v30  ;;  %v3228_v30 = vld [vmem:[%s3816_s22 + $0x90] sm:$0xff] }
 0x58f   : > { %1560 = vadd.xlane.f32.xlu2 %v1557_v10  ;;  %v2883_v10 = vld [vmem:[%s3814_s27 + $0x40] sm:$0xf] }
 0x590   : > { %v2884_v13 = vor.u32 %v3188_v11, %v2883_v10 }
 0x591   : > { %1848 = vmatpush.bf16.msrb.mxu1 %v2896_v21  ;;  %1821 = vmatpush.bf16.msrb.mxu3 %v2872_v29  ;;  %v3224_v21 = vld [vmem:[%s3816_s22 + $0x70] sm:$0xff]  ;;  %v3222_v29 = vld [vmem:[%s3816_s22 + $0x60] sm:$0xff] }
 0x592   : > { %1806 = vmatpush.bf16.msrb.mxu2 %v2884_v13  ;;  %1836 = vmatpush.bf16.msrb.mxu0 %v2860_v45  ;;  %v3241_v13 = vld [vmem:[%s3816_s22 + $0xf8] sm:$0xff] }
 0x595   : > { %1849 = vmatpush.bf16.msrb.mxu1 %v2880_v35  ;;  %1822 = vmatpush.bf16.msrb.mxu3 %v2856_v41  ;;  %v3227_v35 = vld [vmem:[%s3816_s22 + $0x88] sm:$0xff] }
 0x596   : > { %1807 = vmatpush.bf16.msrb.mxu2 %v2868_v25  ;;  %v3223_v25 = vld [vmem:[%s3816_s22 + $0x68] sm:$0xff] }
 0x599   : > { %1850 = vmatpush.bf16.msrb.mxu1 %v2864_v48  ;;  %2207 = vmatpush.bf16.msra.mxu3 %v3225_v17  ;;  %v1634_v48 = vperm.slane %v4154_v32, 1 }
 0x59a   : > { %1808 = vmatpush.bf16.msrb.mxu2 %v2852_v40  ;;  %v3220_v40 = vld [vmem:[%s3816_s22 + $0x50] sm:$0xff] }
 0x59d   : > { %2235 = vmatpush.bf16.msra.mxu1 %v3241_v13  ;;  %2208 = vmatpush.bf16.msra.mxu3 %v3224_v21 }
 0x59e   : > { %2193 = vmatpush.bf16.msra.mxu2 %v3217_v16 }
 0x5a1   : > { %2236 = vmatpush.bf16.msra.mxu1 %v3240_v15  ;;  %2209 = vmatpush.bf16.msra.mxu3 %v3223_v25 }
 0x5a2   : > { %2194 = vmatpush.bf16.msra.mxu2 %v3216_v20 }
 0x5a5   : > { %2237 = vmatpush.bf16.msra.mxu1 %v3239_v18  ;;  %2210 = vmatpush.bf16.msra.mxu3 %v3222_v29 }
 0x5a6   : > { %2195 = vmatpush.bf16.msra.mxu2 %v3215_v24 }
 0x5a9   : > { %2238 = vmatpush.bf16.msra.mxu1 %v3238_v23 }
 0x5aa   : > { %2196 = vmatpush.bf16.msra.mxu2 %v3214_v28 }
 0x5ad   : > { %2239 = vmatpush.bf16.msra.mxu1 %v3237_v27 }
 0x5ae   : > { %2197 = vmatpush.bf16.msra.mxu2 %v3213_v33 }
 0x5b1   : > { %2240 = vmatpush.bf16.msra.mxu1 %v3236_v31 }
 0x5b5   : > { %2241 = vmatpush.bf16.msra.mxu1 %v3235_v36 }
 0x5b9   : > { %2242 = vmatpush.bf16.msra.mxu1 %v3234_v44 }
 0x5fa   : > { %v1559_v34 = vpop.xlane.xlu1 %1558 }
 0x5fb   : > { %v1562_v39 = vmul.f32 %v1559_v34, %v4037_v62  ;;  %v3221_v34 = vld [vmem:[%s3816_s22 + $0x58] sm:$0xff] }
 0x5fc   : > { %2211 = vmatpush.bf16.msra.mxu3 %v3221_v34 }
 0x5fd   : > { %v1564_v47 = vadd.f32 1e-05, %v1562_v39  ;;  %v3212_v39 = vld [vmem:[%s3816_s22 + $0x10] sm:$0xff] }
 0x5fe   : > { %2198 = vmatpush.bf16.msra.mxu2 %v3212_v39 }
 0x5ff   : > { %3347 = vrsqrt.f32 %v1564_v47  ;;  %vm1572_vm10 = vweird.f32 %v1564_v47 }
 0x600   : > { %2212 = vmatpush.bf16.msra.mxu3 %v3220_v40 }
 0x602   : > { %v1561_v49 = vpop.xlane.xlu2 %1560 }
 0x603   : > { %v1563_v50 = vmul.f32 %v1561_v49, %v4037_v62  ;;  %v3211_v49 = vld [vmem:[%s3816_s22 + $0x8] sm:$0xff] }
 0x604   : > { %2199 = vmatpush.bf16.msra.mxu2 %v3211_v49 }
 0x605   : > { %v3348_v51 = vpop.eup %3347  ;;  %v1565_v52 = vadd.f32 1e-05, %v1563_v50  ;;  %v3219_v50 = vld [vmem:[%s3816_s22 + $0x48] sm:$0xff] }
 0x606   : > { %v1567_v53 = vmul.f32 %v3348_v51, %v1564_v47  ;;  %vm1573_vm9 = vweird.f32 %v3348_v51  ;;  %v1633_v47 = vperm.slane %v4154_v32, 0  ;;  %2213 = vmatpush.bf16.msra.mxu3 %v3219_v50 }
 0x607   : > { %3349 = vrsqrt.f32 %v1565_v52  ;;  %vm1574_vm11 = vmor %vm1572_vm10, %vm1573_vm9  ;;  %vm1582_vm13 = vweird.f32 %v1565_v52 }
 0x608   : > { %v1568_v54 = vmul.f32 %v3348_v51, %v1567_v53 }
 0x60a   : > { %v1569_v56 = vmul.f32 0.5, %v1568_v54 }
 0x60c   : > { %v1570_v7 = vsub.f32 1.5, %v1569_v56 }
 0x60d   : > { %v3350_v55 = vpop.eup %3349 }
 0x60e   : > { %v1571_v57 = vmul.f32 %v3348_v51, %v1570_v7  ;;  %v1577_v58 = vmul.f32 %v3350_v55, %v1565_v52  ;;  %vm1583_vm12 = vweird.f32 %v3350_v55 }
 0x60f   : > { %vm1584_vm14 = vmor %vm1582_vm13, %vm1583_vm12 }
 0x610   : > { %v1578_v59 = vmul.f32 %v3350_v55, %v1577_v58  ;;  %v1575_v60 = vsel %vm1574_vm11, %v3348_v51, %v1571_v57  ;;  %v3210_v58 = vld [vmem:[%s3816_s22] sm:$0xff] }
 0x611   : > { %v1586_v1 = vmul.f32 %v1575_v60, %v4040_v4  ;;  %v3325_v4 = vld [vmem:[%s4309_s15] ss:$0 sm:$0xff]  ;;  %2200 = vmatpush.bf16.msra.mxu2 %v3210_v58 }
 0x612   : > { %v1579_v61 = vmul.f32 0.5, %v1578_v59  ;;  %v3218_v59 = vld [vmem:[%s3816_s22 + $0x40] sm:$0xff] }
 0x613   : > { %v1591_v6 = vmul.f32 %v3324_v2, %v1586_v1  ;;  %2214 = vmatpush.bf16.msra.mxu3 %v3218_v59 }
 0x614   : > { %v1580_v0 = vsub.f32 1.5, %v1579_v61 }
 0x615   : > { %v4127_v10 = vadd.f32 %v3325_v4, %v1591_v6 }
 0x616   : > { %v1581_v3 = vmul.f32 %v3350_v55, %v1580_v0 }
 0x618   : > { %v1585_v63 = vsel %vm1584_vm14, %v3350_v55, %v1581_v3 }
 0x619   : > { %v1587_v5 = vmul.f32 %v1585_v63, %v4045_v9  ;;  %v3233_v9 = vld [vmem:[%s3816_s22 + $0xb8] sm:$0xff] }
 0x61a   : > { %2221 = vmatpush.bf16.msra.mxu0 %v3233_v9 }
 0x61b   : > { %v1592_v8 = vmul.f32 %v3324_v2, %v1587_v5 }
 0x61d   : > { %v4129_v11 = vadd.f32 %v3325_v4, %v1592_v8 }
 0x61e   : > { %2222 = vmatpush.bf16.msra.mxu0 %v3232_v14 }
 0x61f   : > { %v1598_v12 = vpack.c.bf16 %v4129_v11, %v4127_v10 }
 0x621   : > { %1809 = vmatmul.bf16.vlgmr.msrb.gmra.mxu2 %v1598_v12  ;;  %1823 = vmatmul.bf16.vlgmr.msrb.gmra.mxu3 %v1598_v12 }
 0x622   : > { %1837 = vmatmul.bf16.vlgmr.msrb.gmra.mxu0 %v1598_v12  ;;  %1851 = vmatmul.bf16.vlgmr.msrb.gmra.mxu1 %v1598_v12 }
 0x623   : > { %2223 = vmatpush.bf16.msra.mxu0 %v3231_v19 }
 0x627   : > { %2224 = vmatpush.bf16.msra.mxu0 %v3230_v22 }
 0x62b   : > { %2225 = vmatpush.bf16.msra.mxu0 %v3229_v26 }
 0x62f   : > { %2226 = vmatpush.bf16.msra.mxu0 %v3228_v30 }
 0x633   : > { %2227 = vmatpush.bf16.msra.mxu0 %v3227_v35 }
 0x637   : > { %2228 = vmatpush.bf16.msra.mxu0 %v3226_v43 }
 0x69f   : > { %v1838_v41 = vpop.f32.mrf.mxu0  ;;  %v1852_v42 = vpop.f32.mrf.mxu1 }
 0x6a0   : > { %v4166_v45 = vadd.f32 %v1838_v41, %v1635_v37  ;;  %v4168_v46 = vadd.f32 %v1852_v42, %v1636_v38 }
 0x6a2   : > { %v1859_v51 = vmul.f32 %v4166_v45, %v4166_v45  ;;  %v1860_v52 = vmul.f32 %v4168_v46, %v4168_v46 }
 0x6a4   : > { %v1867_v53 = vmul.f32 %v1859_v51, %v4166_v45  ;;  %v1868_v54 = vmul.f32 %v1860_v52, %v4168_v46  ;;  %v1810_v56 = vpop.f32.mrf.mxu2  ;;  %v1824_v7 = vpop.f32.mrf.mxu3 }
 0x6a5   : > { %v4180_v55 = vadd.f32 %v1810_v56, %v1633_v47  ;;  %v4182_v57 = vadd.f32 %v1824_v7, %v1634_v48 }
 0x6a6   : > { %v1875_v60 = vmul.f32 0.044715, %v1867_v53  ;;  %v1876_v61 = vmul.f32 0.044715, %v1868_v54 }
 0x6a7   : > { %v1857_v0 = vmul.f32 %v4180_v55, %v4180_v55  ;;  %v1858_v1 = vmul.f32 %v4182_v57, %v4182_v57  ;;  %v1840_v2 = vpop.f32.mrf.mxu0  ;;  %v1854_v3 = vpop.f32.mrf.mxu1 }
 0x6a8   : > { %v1883_v63 = vadd.f32 %v1875_v60, %v4166_v45  ;;  %v1884_v5 = vadd.f32 %v1876_v61, %v4168_v46  ;;  %v1841_v6 = vadd.f32 %v1840_v2, %v1635_v37  ;;  %v4192_v4 = vadd.f32 %v1854_v3, %v1636_v38 }
 0x6a9   : > { %v1865_v8 = vmul.f32 %v1857_v0, %v4180_v55  ;;  %v1866_v12 = vmul.f32 %v1858_v1, %v4182_v57 }
 0x6aa   : > { %v1891_v9 = vmul.f32 0.7978846, %v1883_v63  ;;  %v1863_v13 = vmul.f32 %v1841_v6, %v1841_v6  ;;  %v1864_v14 = vmul.f32 %v4192_v4, %v4192_v4  ;;  %v1892_v15 = vmul.f32 0.7978846, %v1884_v5 }
 0x6ab   : > { %v1873_v16 = vmul.f32 0.044715, %v1865_v8  ;;  %v1874_v17 = vmul.f32 0.044715, %v1866_v12 }
 0x6ac   : > { %v1871_v19 = vmul.f32 %v1863_v13, %v1841_v6  ;;  %v1872_v18 = vmul.f32 %v1864_v14, %v4192_v4  ;;  %v1812_v20 = vpop.f32.mrf.mxu2  ;;  %v1826_v21 = vpop.f32.mrf.mxu3  ;;  %3351 = vtanh.f32 %v1891_v9 }
 0x6ad   : > { %v1881_v22 = vadd.f32 %v1873_v16, %v4180_v55  ;;  %v1882_v23 = vadd.f32 %v1874_v17, %v4182_v57  ;;  %v1813_v24 = vadd.f32 %v1812_v20, %v1633_v47  ;;  %v1827_v27 = vadd.f32 %v1826_v21, %v1634_v48 }
 0x6ae   : > { %v1879_v25 = vmul.f32 0.044715, %v1871_v19  ;;  %v1880_v26 = vmul.f32 0.044715, %v1872_v18  ;;  %3353 = vtanh.f32 %v1892_v15 }
 0x6af   : > { %v1889_v28 = vmul.f32 0.7978846, %v1881_v22  ;;  %v1890_v29 = vmul.f32 0.7978846, %v1882_v23  ;;  %v1861_v30 = vmul.f32 %v1813_v24, %v1813_v24  ;;  %v1862_v33 = vmul.f32 %v1827_v27, %v1827_v27 }
 0x6b0   : > { %v1887_v31 = vadd.f32 %v1879_v25, %v1841_v6  ;;  %v1888_v32 = vadd.f32 %v1880_v26, %v4192_v4 }
 0x6b1   : > { %v1869_v34 = vmul.f32 %v1861_v30, %v1813_v24  ;;  %3355 = vtanh.f32 %v1889_v28  ;;  %v1870_v37 = vmul.f32 %v1862_v33, %v1827_v27 }
 0x6b2   : > { %v1895_v35 = vmul.f32 0.7978846, %v1887_v31  ;;  %v1896_v36 = vmul.f32 0.7978846, %v1888_v32  ;;  %3357 = vtanh.f32 %v1890_v29  ;;  %v3352_v39 = vpop.eup %3351 }
 0x6b3   : > { %v1877_v38 = vmul.f32 0.044715, %v1869_v34  ;;  %v1878_v40 = vmul.f32 0.044715, %v1870_v37  ;;  %v1907_v44 = vadd.f32 1.0, %v3352_v39 }
 0x6b4   : > { %3359 = vtanh.f32 %v1895_v35  ;;  %v3354_v41 = vpop.eup %3353 }
 0x6b5   : > { %3361 = vtanh.f32 %v1896_v36  ;;  %v1885_v42 = vadd.f32 %v1877_v38, %v1813_v24  ;;  %v1886_v43 = vadd.f32 %v1878_v40, %v1827_v27  ;;  %v1908_v49 = vadd.f32 1.0, %v3354_v41 }
 0x6b6   : > { %v1915_v54 = vmul.f32 0.5, %v1907_v44 }
 0x6b7   : > { %v1893_v47 = vmul.f32 0.7978846, %v1885_v42  ;;  %v3356_v48 = vpop.eup %3355  ;;  %v1894_v50 = vmul.f32 0.7978846, %v1886_v43  ;;  %v1916_v7 = vmul.f32 0.5, %v1908_v49 }
 0x6b8   : > { %v3358_v51 = vpop.eup %3357  ;;  %v1905_v58 = vadd.f32 1.0, %v3356_v48  ;;  %v1923_v2 = vmul.f32 %v1915_v54, %v4166_v45 }
 0x6b9   : > { %3363 = vtanh.f32 %v1893_v47  ;;  %v1906_v60 = vadd.f32 1.0, %v3358_v51  ;;  %v1924_v5 = vmul.f32 %v1916_v7, %v4168_v46 }
 0x6ba   : > { %v3360_v52 = vpop.eup %3359  ;;  %3365 = vtanh.f32 %v1894_v50  ;;  %v1913_v8 = vmul.f32 0.5, %v1905_v58 }
 0x6bb   : > { %v3362_v53 = vpop.eup %3361  ;;  %v1911_v56 = vadd.f32 1.0, %v3360_v52  ;;  %v1914_v13 = vmul.f32 0.5, %v1906_v60 }
 0x6bc   : > { %v1912_v59 = vadd.f32 1.0, %v3362_v53  ;;  %v1921_v18 = vmul.f32 %v1913_v8, %v4180_v55 }
 0x6bd   : > { %v1919_v61 = vmul.f32 0.5, %v1911_v56  ;;  %v1922_v45 = vmul.f32 %v1914_v13, %v4182_v57 }
 0x6be   : > { %v1920_v0 = vmul.f32 0.5, %v1912_v59 }
 0x6bf   : > { %v3364_v1 = vpop.eup %3363  ;;  %v1927_v3 = vmul.f32 %v1919_v61, %v1841_v6  ;;  %v3327_v61 = vld [vmem:[%s794_s23] ss:$0 sm:$0xff] }
 0x6c0   : > { %v3366_v63 = vpop.eup %3365  ;;  %v1928_v12 = vmul.f32 %v1920_v0, %v4192_v4  ;;  %v1909_v9 = vadd.f32 1.0, %v3364_v1  ;;  %v3326_v4 = vld [vmem:[%s791_s19] ss:$0 sm:$0xff] }
 0x6c1   : > { %v1910_v14 = vadd.f32 1.0, %v3366_v63  ;;  %v1931_v15 = vpack.c.bf16 %v1927_v3, %v1923_v2  ;;  %v3328_v1 = vld [vmem:[%s797_s29] ss:$0 sm:$0xff]  ;;  %s4313_s29 = sld [smem:[#allocation21_spill]] (!%p3105_p10) }
 0x6c2   : > { %v1917_v16 = vmul.f32 0.5, %v1909_v9  ;;  %v1932_v17 = vpack.c.bf16 %v1928_v12, %v1924_v5 }
 0x6c3   : > { %v1918_v19 = vmul.f32 0.5, %v1910_v14  ;;  %2229 = vmatmul.bf16.vlgmr.msra.gmra.mxu0 %v1931_v15 }
 0x6c4   : > { %v1925_v20 = vmul.f32 %v1917_v16, %v1813_v24  ;;  %2243 = vmatmul.bf16.vlgmr.msra.gmra.mxu1 %v1932_v17 }
 0x6c5   : > { %v1926_v6 = vmul.f32 %v1918_v19, %v1827_v27 }
 0x6c6   : > { %v1929_v46 = vpack.c.bf16 %v1925_v20, %v1921_v18 }
 0x6c7   : > { %v1930_v21 = vpack.c.bf16 %v1926_v6, %v1922_v45 }
 0x6c8   : > { %2201 = vmatmul.bf16.vlgmr.msra.gmra.mxu2 %v1929_v46 }
 0x6c9   : > { %2215 = vmatmul.bf16.vlgmr.msra.gmra.mxu3 %v1930_v21 }
 0x740   : > { %v2230_v26 = vpop.f32.mrf.mxu0 }
 0x741   : > { %v2244_v55 = vpop.f32.mrf.mxu1 }
 0x748   : > { %v2232_v33 = vpop.f32.mrf.mxu0 }
 0x749   : > { %v2246_v35 = vpop.f32.mrf.mxu1 }
 0x74b   : > { %v2202_v22 = vpop.f32.mrf.mxu2 }
 0x74c   : > { %v2203_v23 = vadd.f32 %v3326_v4, %v2202_v22  ;;  %v2216_v25 = vpop.f32.mrf.mxu3 }
 0x74e   : > { %v2217_v28 = vadd.f32 %v2216_v25, %v2203_v23 }
 0x750   : > { %v2231_v24 = vadd.f32 %v2230_v26, %v2217_v28 }
 0x752   : > { %v2245_v29 = vadd.f32 %v2244_v55, %v2231_v24 }
 0x753   : > { %v2204_v30 = vpop.f32.mrf.mxu2 }
 0x754   : > { %v2205_v57 = vadd.f32 %v3326_v4, %v2204_v30  ;;  %v2249_v27 = vadd.f32 %v2245_v29, %v4127_v10  ;;  %v2218_v31 = vpop.f32.mrf.mxu3 }
 0x756   : > { %v2219_v32 = vadd.f32 %v2218_v31, %v2205_v57  ;;  %2253 = vadd.xlane.f32.xlu0 %v2249_v27 }
 0x758   : > { %v2233_v34 = vadd.f32 %v2232_v33, %v2219_v32 }
 0x75a   : > { %v2247_v36 = vadd.f32 %v2246_v35, %v2233_v34 }
 0x75c   : > { %v2250_v37 = vadd.f32 %v2247_v36, %v4129_v11 }
 0x75e   : > { %2255 = vadd.xlane.f32.xlu1 %v2250_v37 }
 0x7c9   : > { %v2254_v38 = vpop.xlane.xlu0 %2253 }
 0x7ca   : > { %v2257_v39 = vmul.f32 %v2254_v38, %v4037_v62 }
 0x7cc   : > { %v2259_v40 = vsub.f32 %v2249_v27, %v2257_v39 }
 0x7ce   : > { %v2261_v41 = vmul.f32 %v2259_v40, %v2259_v40 }
 0x7d0   : > { %2263 = vadd.xlane.f32.xlu2 %v2261_v41 }
 0x7d1   : > { %v2256_v42 = vpop.xlane.xlu1 %2255 }
 0x7d2   : > { %v2258_v43 = vmul.f32 %v2256_v42, %v4037_v62 }
 0x7d4   : > { %v2260_v10 = vsub.f32 %v2250_v37, %v2258_v43 }
 0x7d6   : > { %v2262_v44 = vmul.f32 %v2260_v10, %v2260_v10 }
 0x7d8   : > { %2265 = vadd.xlane.f32.xlu0 %v2262_v44 }
 0x843   : > { %v2264_v47 = vpop.xlane.xlu2 %2263 }
 0x844   : > { %v2267_v48 = vmul.f32 %v2264_v47, %v4037_v62 }
 0x846   : > { %v2269_v49 = vadd.f32 1e-05, %v2267_v48 }
 0x848   : > { %3367 = vrsqrt.f32 %v2269_v49  ;;  %vm2277_vm0 = vweird.f32 %v2269_v49 }
 0x84b   : > { %v2266_v11 = vpop.xlane.xlu0 %2265 }
 0x84c   : > { %v2268_v50 = vmul.f32 %v2266_v11, %v4037_v62 }
 0x84e   : > { %v3368_v51 = vpop.eup %3367  ;;  %v2270_v52 = vadd.f32 1e-05, %v2268_v50 }
 0x84f   : > { %v2272_v53 = vmul.f32 %v3368_v51, %v2269_v49  ;;  %vm2278_vm15 = vweird.f32 %v3368_v51 }
 0x850   : > { %3369 = vrsqrt.f32 %v2270_v52  ;;  %vm2279_vm1 = vmor %vm2277_vm0, %vm2278_vm15  ;;  %vm2287_vm3 = vweird.f32 %v2270_v52 }
 0x851   : > { %v2273_v54 = vmul.f32 %v3368_v51, %v2272_v53 }
 0x853   : > { %v2274_v56 = vmul.f32 0.5, %v2273_v54 }
 0x855   : > { %v2275_v7 = vsub.f32 1.5, %v2274_v56 }
 0x856   : > { %v3370_v58 = vpop.eup %3369 }
 0x857   : > { %v2276_v59 = vmul.f32 %v3368_v51, %v2275_v7  ;;  %v2282_v60 = vmul.f32 %v3370_v58, %v2270_v52  ;;  %vm2288_vm2 = vweird.f32 %v3370_v58 }
 0x858   : > { %vm2289_vm4 = vmor %vm2287_vm3, %vm2288_vm2 }
 0x859   : > { %v2280_v62 = vsel %vm2279_vm1, %v3368_v51, %v2276_v59  ;;  %v2283_v0 = vmul.f32 %v3370_v58, %v2282_v60 }
 0x85a   : > { %v2291_v2 = vmul.f32 %v2280_v62, %v2259_v40 }
 0x85b   : > { %v2284_v3 = vmul.f32 0.5, %v2283_v0 }
 0x85c   : > { %v2296_v63 = vmul.f32 %v3327_v61, %v2291_v2 }
 0x85d   : > { %v2285_v5 = vsub.f32 1.5, %v2284_v3 }
 0x85e   : > { %v2301_v8 = vadd.f32 %v3328_v1, %v2296_v63 }
 0x85f   : > { %v2286_v12 = vmul.f32 %v3370_v58, %v2285_v5 }
 0x860   : > { %2303 = vst [vmem:[#allocation2] sm:$0xff] %v2301_v8 }
 0x861   : > { %v2290_v9 = vsel %vm2289_vm4, %v3370_v58, %v2286_v12 }
 0x862   : > { %v2292_v13 = vmul.f32 %v2290_v9, %v2260_v10 }
 0x864   : > { %v2297_v14 = vmul.f32 %v3327_v61, %v2292_v13  ;;  %2308 = sbr.rel (%p3105_p10) target bundleno = 2431 (0x97f), region = 112 }
 0x866   : > { %v2302_v15 = vadd.f32 %v3328_v1, %v2297_v14 }
 0x868   : > { %2304 = vst [vmem:[#allocation2 + $0x8] sm:$0xff] %v2302_v15 }
 0x869   : > { %v2310_v17 = vld [vmem:[#allocation2] sm:$0xff]  ;;  %vm2336_vm5 = vcmask 1041408  }
 0x86a   : > { %v2309_v19 = vld [vmem:[%s4313_s29] sm:$0x3] }
 0x86f   : > { %v2311_v16 = vld [vmem:[#allocation2 + $0x8] sm:$0xff] }
 0x870   : > { %2329 = vmatpush.msra.mxu0 %v2311_v16 }
 0x872   : > { %2330 = vmatpush.msra.mxu0 %v2310_v17 }
 0x873   : > { %3106 = vmatmul.msk.f32.vlgmr.msra.gmra.mxu0 %vm1274_vm7, %v2309_v19 }
 0x8f0   : > { %v2332_v18 = vpop.f32.mrf.mxu0 }
 0x8f1   : > { %v2335_v20 = vmul.f32 %v2332_v18, %v2332_v18 }
 0x8f3   : > { %v2337_v45 = vsel %vm2336_vm5, %v2335_v20, 0.0 }
 0x8f4   : > { %2338 = vadd.xlane.f32.xlu0 %v2337_v45 }
 0x967   : > { %v2339_v6 = vpop.xlane.xlu0 %2338 }
 0x968   : > { %v2340_v46 = vmax.f32 %v2339_v6, 1e-24 }
 0x96a   : > { %3371 = vrsqrt.f32 %v2340_v46  ;;  %vm2347_vm8 = vweird.f32 %v2340_v46 }
 0x970   : > { %v3372_v21 = vpop.eup %3371 }
 0x971   : > { %v2342_v4 = vmul.f32 %v3372_v21, %v2340_v46  ;;  %vm2348_vm6 = vweird.f32 %v3372_v21 }
 0x972   : > { %vm2349_vm9 = vmor %vm2347_vm8, %vm2348_vm6 }
 0x973   : > { %v2343_v22 = vmul.f32 %v3372_v21, %v2342_v4 }
 0x975   : > { %v2344_v23 = vmul.f32 0.5, %v2343_v22 }
 0x977   : > { %v2345_v25 = vsub.f32 1.5, %v2344_v23 }
 0x979   : > { %v2346_v26 = vmul.f32 %v3372_v21, %v2345_v25 }
 0x97b   : > { %v2350_v28 = vsel %vm2349_vm9, %v3372_v21, %v2346_v26 }
 0x97c   : > { %v2351_v55 = vmul.f32 %v2350_v28, %v2332_v18 }
 0x97e   : > { %2352 = vst [vmem:[#allocation11] sm:$0x3] %v2351_v55 }
 0x97f PF: > { %p3272_p5 = scmp.eq.s32.totalorder %s3687_s28, 1  ;;  %s3577_s2 = smov [#allocation11]  }
 0x980   : > { %s2359_s21 = sshll.u32 %s3577_s2, 4  ;;  %s4314_s7 = sld [smem:[#allocation31_spill]]  ;;  %s2360_s21 = int_to_ptr.vmem [resolvable:$true] %s2359_s21 }
 0x986   : > { %s2361_s27 = sshll.u32 %s4314_s7, 4  ;;  %s2362_s27 = int_to_ptr.hbm [resolvable:$true] %s2361_s27 }
 0x987   : > { %3255 = dma.vmem_to_hbm [thread:$0]  (%p3272_p5), %s2360_s21, 32, %s2362_s27, [#allocation5]  }
 0x988   : > { %3550 = dma.done.wait (%p3272_p5), [#allocation5], 32  }
 0x989   : > { %3552 = vsyncadd (%p3272_p5), [#allocation5], 4294967264 }
 0x98a PF: > { %s4315_s27 = sld [smem:[#allocation17_spill]]  ;;  %s4318_s24 = smov %s3559_s25 }
 0x98b   : > { %s4316_s0 = sld [smem:[#allocation16_spill]] }
 0x98c   : > { %s4317_s26 = sld [smem:[#allocation18_spill]] }
 0x990   : > { %p34_p9 = scmp.ge.s32.totalorder %s4315_s27, 4  }
 0x991   : > { %s4319_s25 = smov %s4316_s0 }
 0x992   :  { %36 = sbr.rel (!%p34_p9) target bundleno = 22 (0x16), region = 195 }
 0x997   :  { %2375 = vsyncpa [#allocation4], 1 }
 0x998   :  { %2377 = vsyncpa [#allocation4 + $0x1], 1 }
 0x999   :  { %2378 = vsyncpa [#allocation7], 1 }
 0x99a   :  { %2380 = vsyncpa [#allocation7 + $0x1], 1 }
 0x99b   :  { %2381 = vsyncpa [#allocation10], 1 }
 0x99c   :  { %2383 = vsyncpa [#allocation10 + $0x1], 1 }
 0x99d   :  { %2384 = vsyncpa [#allocation5], 1 }
 0x99e   :  { %2386 = vsyncpa [#allocation5 + $0x1], 1 }

</bundles_post_ra>
